<compile_context>
chip_gen: v6e
topology: v6e:2x2x1
jax: 0.10.0
libtpu: 0.0.40
codegen_flags: <defaults>
</compile_context>

<pallas_src>
import functools

import jax
import jax.numpy as jnp
from jax.experimental import pallas as pl
from jax.experimental.pallas import tpu as pltpu


def _orb_kernel(x_ref, masks_ref, w1s_ref, w2s_ref, caw1s_ref, caw2s_ref,
                wtail_ref, o_ref, *, h, w):
    # x_ref     : VMEM (1, C, H*W)           one batch element, flat spatial
    # masks_ref : VMEM (9, 1, H*W)           boundary masks for the 3x3 stencil
    # w1s_ref   : VMEM (num_cab, C, 9*C)     CAB conv1 weights (im2col layout)
    # w2s_ref   : VMEM (num_cab, C, 9*C)     CAB conv2 weights (im2col layout)
    # caw1s_ref : VMEM (num_cab, C//r, C)    CA 1x1 "down" weights
    # caw2s_ref : VMEM (num_cab, C, C//r)    CA 1x1 "up" weights
    # wtail_ref : VMEM (C, 9*C)              ORB tail conv weights (im2col layout)
    # o_ref     : VMEM (1, C, H*W)
    c = x_ref.shape[1]
    hw = h * w
    num_cab = w1s_ref.shape[0]
    pad = w + 1                       # covers every |flat shift| of a 3x3 stencil
    inv_hw = 1.0 / float(hw)

    # Static flat-index shifts of the 3x3 stencil (row-major H*W layout).
    shifts = [(ky - 1) * w + (kx - 1) for ky in range(3) for kx in range(3)]
    # Hoist mask loads (each (1, HW)); reused by every conv in the block.
    masks = [masks_ref[k] for k in range(9)]
    zpad = jnp.zeros((c, pad), jnp.float32)

    x_flat = x_ref[0].astype(jnp.float32)                       # (C, HW)

    def conv3x3(a_flat, w_mat):
        """3x3 'same' convolution as a single MXU matmul (im2col by shifts)."""
        a_ext = jnp.concatenate([zpad, a_flat, zpad], axis=1)   # (C, HW + 2*pad)
        cols = jnp.concatenate(
            [a_ext[:, pad + s: pad + s + hw] * masks[k]
             for k, s in enumerate(shifts)],
            axis=0)                                             # (9*C, HW)
        return jnp.dot(w_mat, cols, preferred_element_type=jnp.float32)  # (C, HW)

    feat = x_flat
    for i in range(num_cab):
        r = conv3x3(feat, w1s_ref[i])                           # conv
        r = jnp.maximum(r, 0.0)                                 # act (ReLU)
        r = conv3x3(r, w2s_ref[i])                              # conv
        # Channel attention: global avg pool -> 1x1 -> ReLU -> 1x1 -> sigmoid.
        pooled = jnp.sum(r, axis=1, keepdims=True) * inv_hw     # (C, 1)
        hid = jnp.maximum(
            jnp.dot(caw1s_ref[i], pooled,
                    preferred_element_type=jnp.float32), 0.0)   # (C//r, 1)
        logit = jnp.dot(caw2s_ref[i], hid,
                        preferred_element_type=jnp.float32)     # (C, 1)
        gate = 1.0 / (1.0 + jnp.exp(-logit))
        feat = r * gate + feat                                  # CAB residual
    res = conv3x3(feat, wtail_ref[...]) + x_flat                # tail conv + ORB residual
    o_ref[0] = res.astype(o_ref.dtype)


def orb_forward(x, w1s, w2s, caw1s, caw2s, wtail):
    """x: (N, C, H, W) f32.  Conv weights in PyTorch OIHW layout:
       w1s/w2s: (num_cab, C, C, 3, 3), caw1s: (num_cab, C//r, C),
       caw2s: (num_cab, C, C//r), wtail: (C, C, 3, 3)."""
    n, c, h, w = x.shape
    num_cab = w1s.shape[0]
    cr = caw1s.shape[1]
    hw = h * w

    # ---- glue (layout prep only, no hot-path compute) ----
    # im2col weight layout: (C_out, C_in, 3, 3) -> (C_out, 9*C_in) with columns
    # ordered (ky, kx, ci), matching the kernel's column stacking.
    w1_mat = jnp.transpose(w1s, (0, 1, 3, 4, 2)).reshape(num_cab, c, 9 * c)
    w2_mat = jnp.transpose(w2s, (0, 1, 3, 4, 2)).reshape(num_cab, c, 9 * c)
    wtail_mat = jnp.transpose(wtail, (0, 2, 3, 1)).reshape(c, 9 * c)

    # Boundary masks for the 9 stencil taps in the flat row-major layout.
    yy, xx = jnp.meshgrid(jnp.arange(h), jnp.arange(w), indexing="ij")
    masks = jnp.stack([
        ((yy + (ky - 1) >= 0) & (yy + (ky - 1) < h)
         & (xx + (kx - 1) >= 0) & (xx + (kx - 1) < w)).reshape(1, hw)
        for ky in range(3) for kx in range(3)
    ]).astype(jnp.float32)                                      # (9, 1, HW)

    x_flat = x.reshape(n, c, hw)                                # lane-dense input

    out_flat = pl.pallas_call(
        functools.partial(_orb_kernel, h=h, w=w),
        out_shape=jax.ShapeDtypeStruct((n, c, hw), x.dtype),
        grid=(n,),
        in_specs=[
            pl.BlockSpec((1, c, hw), lambda b: (b, 0, 0)),            # x (per batch)
            pl.BlockSpec((9, 1, hw), lambda b: (0, 0, 0)),            # stencil masks
            pl.BlockSpec((num_cab, c, 9 * c), lambda b: (0, 0, 0)),   # CAB conv1 w
            pl.BlockSpec((num_cab, c, 9 * c), lambda b: (0, 0, 0)),   # CAB conv2 w
            pl.BlockSpec((num_cab, cr, c), lambda b: (0, 0, 0)),      # CA 1x1 down
            pl.BlockSpec((num_cab, c, cr), lambda b: (0, 0, 0)),      # CA 1x1 up
            pl.BlockSpec((c, 9 * c), lambda b: (0, 0)),               # tail conv w
        ],
        out_specs=pl.BlockSpec((1, c, hw), lambda b: (b, 0, 0)),
        compiler_params=pltpu.CompilerParams(
            dimension_semantics=("parallel",)),
    )(x_flat, masks, w1_mat, w2_mat, caw1s, caw2s, wtail_mat)

    return out_flat.reshape(n, c, h, w)


def _orb_reference(x, w1s, w2s, caw1s, caw2s, wtail):
    """Plain-JAX reference with identical math (PyTorch semantics)."""
    hp = jax.lax.Precision.HIGHEST

    def conv3x3(a, wt):
        return jax.lax.conv_general_dilated(
            a, wt, window_strides=(1, 1), padding=((1, 1), (1, 1)),
            dimension_numbers=("NCHW", "OIHW", "NCHW"), precision=hp)

    feat = x
    for i in range(w1s.shape[0]):
        r = conv3x3(feat, w1s[i])
        r = jnp.maximum(r, 0.0)
        r = conv3x3(r, w2s[i])
        y = jnp.mean(r, axis=(2, 3), keepdims=True)
        y = jnp.maximum(jnp.einsum("oc,nchw->nohw", caw1s[i], y, precision=hp), 0.0)
        y = jax.nn.sigmoid(jnp.einsum("oc,nchw->nohw", caw2s[i], y, precision=hp))
        feat = r * y + feat
    return conv3x3(feat, wtail) + x


if __name__ == "__main__":
    key = jax.random.PRNGKey(0)
    N, C, H, W = 2, 16, 16, 16          # n_feat=16, 16x16 spatial
    REDUCTION, NUM_CAB = 4, 2
    CR = C // REDUCTION

    ks = jax.random.split(key, 6)
    x = jax.random.normal(ks[0], (N, C, H, W), jnp.float32)
    s = 0.1
    w1s = s * jax.random.normal(ks[1], (NUM_CAB, C, C, 3, 3), jnp.float32)
    w2s = s * jax.random.normal(ks[2], (NUM_CAB, C, C, 3, 3), jnp.float32)
    caw1s = s * jax.random.normal(ks[3], (NUM_CAB, CR, C), jnp.float32)
    caw2s = s * jax.random.normal(ks[4], (NUM_CAB, C, CR), jnp.float32)
    wtail = s * jax.random.normal(ks[5], (C, C, 3, 3), jnp.float32)

    out = orb_forward(x, w1s, w2s, caw1s, caw2s, wtail)
    out = jax.block_until_ready(out)

    ref = _orb_reference(x, w1s, w2s, caw1s, caw2s, wtail)
    assert out.shape == (N, C, H, W)
    err = float(jnp.max(jnp.abs(out - ref)))
    assert jnp.allclose(out, ref, atol=1e-3, rtol=1e-3), f"max abs err {err}"

    print("KERNEL_OK")
</pallas_src>

<mosaic_0001>
module attributes {stable_mosaic.version = 11 : i64} {
  func.func @_orb_kernel(%arg0: i32, %arg1: memref<1x16x256xf32, #tpu.memory_space<vmem>>, %arg2: memref<9x1x256xf32, #tpu.memory_space<vmem>>, %arg3: memref<2x16x144xf32, #tpu.memory_space<vmem>>, %arg4: memref<2x16x144xf32, #tpu.memory_space<vmem>>, %arg5: memref<2x4x16xf32, #tpu.memory_space<vmem>>, %arg6: memref<2x16x4xf32, #tpu.memory_space<vmem>>, %arg7: memref<16x144xf32, #tpu.memory_space<vmem>>, %arg8: memref<1x16x256xf32, #tpu.memory_space<vmem>>) attributes {dimension_semantics = [#tpu.dimension_semantics<parallel>], iteration_bounds = array<i64: 2>, scalar_prefetch = 0 : i64, scratch_operands = 0 : i64, tpu.core_type = #tpu.core_type<tc>, window_params = [{transform_indices = @transform_0, window_bounds = array<i64: 1, 16, 256>}, {pipeline_mode = #tpu.pipeline_mode<synchronous>, transform_indices = @transform_1, window_bounds = array<i64: 9, 1, 256>}, {pipeline_mode = #tpu.pipeline_mode<synchronous>, transform_indices = @transform_2, window_bounds = array<i64: 2, 16, 144>}, {pipeline_mode = #tpu.pipeline_mode<synchronous>, transform_indices = @transform_3, window_bounds = array<i64: 2, 16, 144>}, {pipeline_mode = #tpu.pipeline_mode<synchronous>, transform_indices = @transform_4, window_bounds = array<i64: 2, 4, 16>}, {pipeline_mode = #tpu.pipeline_mode<synchronous>, transform_indices = @transform_5, window_bounds = array<i64: 2, 16, 4>}, {pipeline_mode = #tpu.pipeline_mode<synchronous>, transform_indices = @transform_6, window_bounds = array<i64: 16, 144>}, {transform_indices = @transform_7, window_bounds = array<i64: 1, 16, 256>}]} {
    %c0 = arith.constant 0 : index
    %c0_0 = arith.constant 0 : index
    %c0_1 = arith.constant 0 : index
    %0 = vector.load %arg2[%c0, %c0_0, %c0_1] : memref<9x1x256xf32, #tpu.memory_space<vmem>>, vector<1x1x256xf32>
    %1 = vector.shape_cast %0 : vector<1x1x256xf32> to vector<1x256xf32>
    %c1 = arith.constant 1 : index
    %c0_2 = arith.constant 0 : index
    %c0_3 = arith.constant 0 : index
    %2 = vector.load %arg2[%c1, %c0_2, %c0_3] : memref<9x1x256xf32, #tpu.memory_space<vmem>>, vector<1x1x256xf32>
    %3 = vector.shape_cast %2 : vector<1x1x256xf32> to vector<1x256xf32>
    %c2 = arith.constant 2 : index
    %c0_4 = arith.constant 0 : index
    %c0_5 = arith.constant 0 : index
    %4 = vector.load %arg2[%c2, %c0_4, %c0_5] : memref<9x1x256xf32, #tpu.memory_space<vmem>>, vector<1x1x256xf32>
    %5 = vector.shape_cast %4 : vector<1x1x256xf32> to vector<1x256xf32>
    %c3 = arith.constant 3 : index
    %c0_6 = arith.constant 0 : index
    %c0_7 = arith.constant 0 : index
    %6 = vector.load %arg2[%c3, %c0_6, %c0_7] : memref<9x1x256xf32, #tpu.memory_space<vmem>>, vector<1x1x256xf32>
    %7 = vector.shape_cast %6 : vector<1x1x256xf32> to vector<1x256xf32>
    %c4 = arith.constant 4 : index
    %c0_8 = arith.constant 0 : index
    %c0_9 = arith.constant 0 : index
    %8 = vector.load %arg2[%c4, %c0_8, %c0_9] : memref<9x1x256xf32, #tpu.memory_space<vmem>>, vector<1x1x256xf32>
    %9 = vector.shape_cast %8 : vector<1x1x256xf32> to vector<1x256xf32>
    %c5 = arith.constant 5 : index
    %c0_10 = arith.constant 0 : index
    %c0_11 = arith.constant 0 : index
    %10 = vector.load %arg2[%c5, %c0_10, %c0_11] : memref<9x1x256xf32, #tpu.memory_space<vmem>>, vector<1x1x256xf32>
    %11 = vector.shape_cast %10 : vector<1x1x256xf32> to vector<1x256xf32>
    %c6 = arith.constant 6 : index
    %c0_12 = arith.constant 0 : index
    %c0_13 = arith.constant 0 : index
    %12 = vector.load %arg2[%c6, %c0_12, %c0_13] : memref<9x1x256xf32, #tpu.memory_space<vmem>>, vector<1x1x256xf32>
    %13 = vector.shape_cast %12 : vector<1x1x256xf32> to vector<1x256xf32>
    %c7 = arith.constant 7 : index
    %c0_14 = arith.constant 0 : index
    %c0_15 = arith.constant 0 : index
    %14 = vector.load %arg2[%c7, %c0_14, %c0_15] : memref<9x1x256xf32, #tpu.memory_space<vmem>>, vector<1x1x256xf32>
    %15 = vector.shape_cast %14 : vector<1x1x256xf32> to vector<1x256xf32>
    %c8 = arith.constant 8 : index
    %c0_16 = arith.constant 0 : index
    %c0_17 = arith.constant 0 : index
    %16 = vector.load %arg2[%c8, %c0_16, %c0_17] : memref<9x1x256xf32, #tpu.memory_space<vmem>>, vector<1x1x256xf32>
    %17 = vector.shape_cast %16 : vector<1x1x256xf32> to vector<1x256xf32>
    %cst = arith.constant 0.000000e+00 : f32
    %18 = vector.broadcast %cst : f32 to vector<16x17xf32>
    %c0_18 = arith.constant 0 : index
    %c0_19 = arith.constant 0 : index
    %c0_20 = arith.constant 0 : index
    %19 = vector.load %arg1[%c0_18, %c0_19, %c0_20] : memref<1x16x256xf32, #tpu.memory_space<vmem>>, vector<1x16x256xf32>
    %20 = vector.shape_cast %19 : vector<1x16x256xf32> to vector<16x256xf32>
    %c0_21 = arith.constant 0 : index
    %c0_22 = arith.constant 0 : index
    %c0_23 = arith.constant 0 : index
    %21 = vector.load %arg3[%c0_21, %c0_22, %c0_23] : memref<2x16x144xf32, #tpu.memory_space<vmem>>, vector<1x16x144xf32>
    %22 = vector.shape_cast %21 : vector<1x16x144xf32> to vector<16x144xf32>
    %23 = tpu.concatenate %18, %20, %18 in 1 : vector<16x17xf32>, vector<16x256xf32>, vector<16x17xf32> -> vector<16x290xf32>
    %24 = vector.extract_strided_slice %23 {offsets = [0, 0], sizes = [16, 256], strides = [1, 1]} : vector<16x290xf32> to vector<16x256xf32>
    %25 = vector.broadcast %1 : vector<1x256xf32> to vector<16x256xf32>
    %26 = arith.mulf %24, %25 : vector<16x256xf32>
    %27 = vector.extract_strided_slice %23 {offsets = [0, 1], sizes = [16, 256], strides = [1, 1]} : vector<16x290xf32> to vector<16x256xf32>
    %28 = vector.broadcast %3 : vector<1x256xf32> to vector<16x256xf32>
    %29 = arith.mulf %27, %28 : vector<16x256xf32>
    %30 = vector.extract_strided_slice %23 {offsets = [0, 2], sizes = [16, 256], strides = [1, 1]} : vector<16x290xf32> to vector<16x256xf32>
    %31 = vector.broadcast %5 : vector<1x256xf32> to vector<16x256xf32>
    %32 = arith.mulf %30, %31 : vector<16x256xf32>
    %33 = vector.extract_strided_slice %23 {offsets = [0, 16], sizes = [16, 256], strides = [1, 1]} : vector<16x290xf32> to vector<16x256xf32>
    %34 = vector.broadcast %7 : vector<1x256xf32> to vector<16x256xf32>
    %35 = arith.mulf %33, %34 : vector<16x256xf32>
    %36 = vector.extract_strided_slice %23 {offsets = [0, 17], sizes = [16, 256], strides = [1, 1]} : vector<16x290xf32> to vector<16x256xf32>
    %37 = vector.broadcast %9 : vector<1x256xf32> to vector<16x256xf32>
    %38 = arith.mulf %36, %37 : vector<16x256xf32>
    %39 = vector.extract_strided_slice %23 {offsets = [0, 18], sizes = [16, 256], strides = [1, 1]} : vector<16x290xf32> to vector<16x256xf32>
    %40 = vector.broadcast %11 : vector<1x256xf32> to vector<16x256xf32>
    %41 = arith.mulf %39, %40 : vector<16x256xf32>
    %42 = vector.extract_strided_slice %23 {offsets = [0, 32], sizes = [16, 256], strides = [1, 1]} : vector<16x290xf32> to vector<16x256xf32>
    %43 = vector.broadcast %13 : vector<1x256xf32> to vector<16x256xf32>
    %44 = arith.mulf %42, %43 : vector<16x256xf32>
    %45 = vector.extract_strided_slice %23 {offsets = [0, 33], sizes = [16, 256], strides = [1, 1]} : vector<16x290xf32> to vector<16x256xf32>
    %46 = vector.broadcast %15 : vector<1x256xf32> to vector<16x256xf32>
    %47 = arith.mulf %45, %46 : vector<16x256xf32>
    %48 = vector.extract_strided_slice %23 {offsets = [0, 34], sizes = [16, 256], strides = [1, 1]} : vector<16x290xf32> to vector<16x256xf32>
    %49 = vector.broadcast %17 : vector<1x256xf32> to vector<16x256xf32>
    %50 = arith.mulf %48, %49 : vector<16x256xf32>
    %51 = tpu.concatenate %26, %29, %32, %35, %38, %41, %44, %47, %50 in 0 : vector<16x256xf32>, vector<16x256xf32>, vector<16x256xf32>, vector<16x256xf32>, vector<16x256xf32>, vector<16x256xf32>, vector<16x256xf32>, vector<16x256xf32>, vector<16x256xf32> -> vector<144x256xf32>
    %cst_24 = arith.constant dense<0.000000e+00> : vector<16x256xf32>
    %52 = tpu.matmul %22, %51, %cst_24 {dimension_numbers = #tpu.dot_dimension_numbers<[1], [0], [0], [1], [0, 0, 1, 1], [], []>} : vector<16x144xf32>, vector<144x256xf32>, vector<16x256xf32> -> vector<16x256xf32>
    %cst_25 = arith.constant 0.000000e+00 : f32
    %53 = vector.broadcast %cst_25 : f32 to vector<16x256xf32>
    %54 = arith.maximumf %52, %53 : vector<16x256xf32>
    %c0_26 = arith.constant 0 : index
    %c0_27 = arith.constant 0 : index
    %c0_28 = arith.constant 0 : index
    %55 = vector.load %arg4[%c0_26, %c0_27, %c0_28] : memref<2x16x144xf32, #tpu.memory_space<vmem>>, vector<1x16x144xf32>
    %56 = vector.shape_cast %55 : vector<1x16x144xf32> to vector<16x144xf32>
    %57 = tpu.concatenate %18, %54, %18 in 1 : vector<16x17xf32>, vector<16x256xf32>, vector<16x17xf32> -> vector<16x290xf32>
    %58 = vector.extract_strided_slice %57 {offsets = [0, 0], sizes = [16, 256], strides = [1, 1]} : vector<16x290xf32> to vector<16x256xf32>
    %59 = vector.broadcast %1 : vector<1x256xf32> to vector<16x256xf32>
    %60 = arith.mulf %58, %59 : vector<16x256xf32>
    %61 = vector.extract_strided_slice %57 {offsets = [0, 1], sizes = [16, 256], strides = [1, 1]} : vector<16x290xf32> to vector<16x256xf32>
    %62 = vector.broadcast %3 : vector<1x256xf32> to vector<16x256xf32>
    %63 = arith.mulf %61, %62 : vector<16x256xf32>
    %64 = vector.extract_strided_slice %57 {offsets = [0, 2], sizes = [16, 256], strides = [1, 1]} : vector<16x290xf32> to vector<16x256xf32>
    %65 = vector.broadcast %5 : vector<1x256xf32> to vector<16x256xf32>
    %66 = arith.mulf %64, %65 : vector<16x256xf32>
    %67 = vector.extract_strided_slice %57 {offsets = [0, 16], sizes = [16, 256], strides = [1, 1]} : vector<16x290xf32> to vector<16x256xf32>
    %68 = vector.broadcast %7 : vector<1x256xf32> to vector<16x256xf32>
    %69 = arith.mulf %67, %68 : vector<16x256xf32>
    %70 = vector.extract_strided_slice %57 {offsets = [0, 17], sizes = [16, 256], strides = [1, 1]} : vector<16x290xf32> to vector<16x256xf32>
    %71 = vector.broadcast %9 : vector<1x256xf32> to vector<16x256xf32>
    %72 = arith.mulf %70, %71 : vector<16x256xf32>
    %73 = vector.extract_strided_slice %57 {offsets = [0, 18], sizes = [16, 256], strides = [1, 1]} : vector<16x290xf32> to vector<16x256xf32>
    %74 = vector.broadcast %11 : vector<1x256xf32> to vector<16x256xf32>
    %75 = arith.mulf %73, %74 : vector<16x256xf32>
    %76 = vector.extract_strided_slice %57 {offsets = [0, 32], sizes = [16, 256], strides = [1, 1]} : vector<16x290xf32> to vector<16x256xf32>
    %77 = vector.broadcast %13 : vector<1x256xf32> to vector<16x256xf32>
    %78 = arith.mulf %76, %77 : vector<16x256xf32>
    %79 = vector.extract_strided_slice %57 {offsets = [0, 33], sizes = [16, 256], strides = [1, 1]} : vector<16x290xf32> to vector<16x256xf32>
    %80 = vector.broadcast %15 : vector<1x256xf32> to vector<16x256xf32>
    %81 = arith.mulf %79, %80 : vector<16x256xf32>
    %82 = vector.extract_strided_slice %57 {offsets = [0, 34], sizes = [16, 256], strides = [1, 1]} : vector<16x290xf32> to vector<16x256xf32>
    %83 = vector.broadcast %17 : vector<1x256xf32> to vector<16x256xf32>
    %84 = arith.mulf %82, %83 : vector<16x256xf32>
    %85 = tpu.concatenate %60, %63, %66, %69, %72, %75, %78, %81, %84 in 0 : vector<16x256xf32>, vector<16x256xf32>, vector<16x256xf32>, vector<16x256xf32>, vector<16x256xf32>, vector<16x256xf32>, vector<16x256xf32>, vector<16x256xf32>, vector<16x256xf32> -> vector<144x256xf32>
    %cst_29 = arith.constant dense<0.000000e+00> : vector<16x256xf32>
    %86 = tpu.matmul %56, %85, %cst_29 {dimension_numbers = #tpu.dot_dimension_numbers<[1], [0], [0], [1], [0, 0, 1, 1], [], []>} : vector<16x144xf32>, vector<144x256xf32>, vector<16x256xf32> -> vector<16x256xf32>
    %cst_30 = arith.constant dense<0.000000e+00> : vector<16xf32>
    %87 = vector.multi_reduction <add>, %86, %cst_30 [1] : vector<16x256xf32> to vector<16xf32>
    %88 = vector.shape_cast %87 : vector<16xf32> to vector<16x1xf32>
    %cst_31 = arith.constant 3.906250e-03 : f32
    %89 = vector.broadcast %cst_31 : f32 to vector<16x1xf32>
    %90 = arith.mulf %88, %89 : vector<16x1xf32>
    %c0_32 = arith.constant 0 : index
    %c0_33 = arith.constant 0 : index
    %c0_34 = arith.constant 0 : index
    %91 = vector.load %arg5[%c0_32, %c0_33, %c0_34] : memref<2x4x16xf32, #tpu.memory_space<vmem>>, vector<1x4x16xf32>
    %92 = vector.shape_cast %91 : vector<1x4x16xf32> to vector<4x16xf32>
    %cst_35 = arith.constant dense<0.000000e+00> : vector<4x1xf32>
    %93 = tpu.matmul %92, %90, %cst_35 {dimension_numbers = #tpu.dot_dimension_numbers<[1], [0], [0], [1], [0, 0, 1, 1], [], []>} : vector<4x16xf32>, vector<16x1xf32>, vector<4x1xf32> -> vector<4x1xf32>
    %cst_36 = arith.constant 0.000000e+00 : f32
    %94 = vector.broadcast %cst_36 : f32 to vector<4x1xf32>
    %95 = arith.maximumf %93, %94 : vector<4x1xf32>
    %c0_37 = arith.constant 0 : index
    %c0_38 = arith.constant 0 : index
    %c0_39 = arith.constant 0 : index
    %96 = vector.load %arg6[%c0_37, %c0_38, %c0_39] : memref<2x16x4xf32, #tpu.memory_space<vmem>>, vector<1x16x4xf32>
    %97 = vector.shape_cast %96 : vector<1x16x4xf32> to vector<16x4xf32>
    %cst_40 = arith.constant dense<0.000000e+00> : vector<16x1xf32>
    %98 = tpu.matmul %97, %95, %cst_40 {dimension_numbers = #tpu.dot_dimension_numbers<[1], [0], [0], [1], [0, 0, 1, 1], [], []>} : vector<16x4xf32>, vector<4x1xf32>, vector<16x1xf32> -> vector<16x1xf32>
    %cst_41 = arith.constant 0.000000e+00 : f32
    %99 = vector.broadcast %cst_41 : f32 to vector<16x1xf32>
    %100 = arith.subf %99, %98 : vector<16x1xf32>
    %101 = math.exp %100 : vector<16x1xf32>
    %cst_42 = arith.constant 1.000000e+00 : f32
    %102 = vector.broadcast %cst_42 : f32 to vector<16x1xf32>
    %103 = arith.addf %102, %101 : vector<16x1xf32>
    %cst_43 = arith.constant 1.000000e+00 : f32
    %104 = vector.broadcast %cst_43 : f32 to vector<16x1xf32>
    %105 = arith.divf %104, %103 : vector<16x1xf32>
    %106 = vector.broadcast %105 : vector<16x1xf32> to vector<16x256xf32>
    %107 = arith.mulf %86, %106 : vector<16x256xf32>
    %108 = arith.addf %107, %20 : vector<16x256xf32>
    %c1_44 = arith.constant 1 : index
    %c0_45 = arith.constant 0 : index
    %c0_46 = arith.constant 0 : index
    %109 = vector.load %arg3[%c1_44, %c0_45, %c0_46] : memref<2x16x144xf32, #tpu.memory_space<vmem>>, vector<1x16x144xf32>
    %110 = vector.shape_cast %109 : vector<1x16x144xf32> to vector<16x144xf32>
    %111 = tpu.concatenate %18, %108, %18 in 1 : vector<16x17xf32>, vector<16x256xf32>, vector<16x17xf32> -> vector<16x290xf32>
    %112 = vector.extract_strided_slice %111 {offsets = [0, 0], sizes = [16, 256], strides = [1, 1]} : vector<16x290xf32> to vector<16x256xf32>
    %113 = vector.broadcast %1 : vector<1x256xf32> to vector<16x256xf32>
    %114 = arith.mulf %112, %113 : vector<16x256xf32>
    %115 = vector.extract_strided_slice %111 {offsets = [0, 1], sizes = [16, 256], strides = [1, 1]} : vector<16x290xf32> to vector<16x256xf32>
    %116 = vector.broadcast %3 : vector<1x256xf32> to vector<16x256xf32>
    %117 = arith.mulf %115, %116 : vector<16x256xf32>
    %118 = vector.extract_strided_slice %111 {offsets = [0, 2], sizes = [16, 256], strides = [1, 1]} : vector<16x290xf32> to vector<16x256xf32>
    %119 = vector.broadcast %5 : vector<1x256xf32> to vector<16x256xf32>
    %120 = arith.mulf %118, %119 : vector<16x256xf32>
    %121 = vector.extract_strided_slice %111 {offsets = [0, 16], sizes = [16, 256], strides = [1, 1]} : vector<16x290xf32> to vector<16x256xf32>
    %122 = vector.broadcast %7 : vector<1x256xf32> to vector<16x256xf32>
    %123 = arith.mulf %121, %122 : vector<16x256xf32>
    %124 = vector.extract_strided_slice %111 {offsets = [0, 17], sizes = [16, 256], strides = [1, 1]} : vector<16x290xf32> to vector<16x256xf32>
    %125 = vector.broadcast %9 : vector<1x256xf32> to vector<16x256xf32>
    %126 = arith.mulf %124, %125 : vector<16x256xf32>
    %127 = vector.extract_strided_slice %111 {offsets = [0, 18], sizes = [16, 256], strides = [1, 1]} : vector<16x290xf32> to vector<16x256xf32>
    %128 = vector.broadcast %11 : vector<1x256xf32> to vector<16x256xf32>
    %129 = arith.mulf %127, %128 : vector<16x256xf32>
    %130 = vector.extract_strided_slice %111 {offsets = [0, 32], sizes = [16, 256], strides = [1, 1]} : vector<16x290xf32> to vector<16x256xf32>
    %131 = vector.broadcast %13 : vector<1x256xf32> to vector<16x256xf32>
    %132 = arith.mulf %130, %131 : vector<16x256xf32>
    %133 = vector.extract_strided_slice %111 {offsets = [0, 33], sizes = [16, 256], strides = [1, 1]} : vector<16x290xf32> to vector<16x256xf32>
    %134 = vector.broadcast %15 : vector<1x256xf32> to vector<16x256xf32>
    %135 = arith.mulf %133, %134 : vector<16x256xf32>
    %136 = vector.extract_strided_slice %111 {offsets = [0, 34], sizes = [16, 256], strides = [1, 1]} : vector<16x290xf32> to vector<16x256xf32>
    %137 = vector.broadcast %17 : vector<1x256xf32> to vector<16x256xf32>
    %138 = arith.mulf %136, %137 : vector<16x256xf32>
    %139 = tpu.concatenate %114, %117, %120, %123, %126, %129, %132, %135, %138 in 0 : vector<16x256xf32>, vector<16x256xf32>, vector<16x256xf32>, vector<16x256xf32>, vector<16x256xf32>, vector<16x256xf32>, vector<16x256xf32>, vector<16x256xf32>, vector<16x256xf32> -> vector<144x256xf32>
    %cst_47 = arith.constant dense<0.000000e+00> : vector<16x256xf32>
    %140 = tpu.matmul %110, %139, %cst_47 {dimension_numbers = #tpu.dot_dimension_numbers<[1], [0], [0], [1], [0, 0, 1, 1], [], []>} : vector<16x144xf32>, vector<144x256xf32>, vector<16x256xf32> -> vector<16x256xf32>
    %cst_48 = arith.constant 0.000000e+00 : f32
    %141 = vector.broadcast %cst_48 : f32 to vector<16x256xf32>
    %142 = arith.maximumf %140, %141 : vector<16x256xf32>
    %c1_49 = arith.constant 1 : index
    %c0_50 = arith.constant 0 : index
    %c0_51 = arith.constant 0 : index
    %143 = vector.load %arg4[%c1_49, %c0_50, %c0_51] : memref<2x16x144xf32, #tpu.memory_space<vmem>>, vector<1x16x144xf32>
    %144 = vector.shape_cast %143 : vector<1x16x144xf32> to vector<16x144xf32>
    %145 = tpu.concatenate %18, %142, %18 in 1 : vector<16x17xf32>, vector<16x256xf32>, vector<16x17xf32> -> vector<16x290xf32>
    %146 = vector.extract_strided_slice %145 {offsets = [0, 0], sizes = [16, 256], strides = [1, 1]} : vector<16x290xf32> to vector<16x256xf32>
    %147 = vector.broadcast %1 : vector<1x256xf32> to vector<16x256xf32>
    %148 = arith.mulf %146, %147 : vector<16x256xf32>
    %149 = vector.extract_strided_slice %145 {offsets = [0, 1], sizes = [16, 256], strides = [1, 1]} : vector<16x290xf32> to vector<16x256xf32>
    %150 = vector.broadcast %3 : vector<1x256xf32> to vector<16x256xf32>
    %151 = arith.mulf %149, %150 : vector<16x256xf32>
    %152 = vector.extract_strided_slice %145 {offsets = [0, 2], sizes = [16, 256], strides = [1, 1]} : vector<16x290xf32> to vector<16x256xf32>
    %153 = vector.broadcast %5 : vector<1x256xf32> to vector<16x256xf32>
    %154 = arith.mulf %152, %153 : vector<16x256xf32>
    %155 = vector.extract_strided_slice %145 {offsets = [0, 16], sizes = [16, 256], strides = [1, 1]} : vector<16x290xf32> to vector<16x256xf32>
    %156 = vector.broadcast %7 : vector<1x256xf32> to vector<16x256xf32>
    %157 = arith.mulf %155, %156 : vector<16x256xf32>
    %158 = vector.extract_strided_slice %145 {offsets = [0, 17], sizes = [16, 256], strides = [1, 1]} : vector<16x290xf32> to vector<16x256xf32>
    %159 = vector.broadcast %9 : vector<1x256xf32> to vector<16x256xf32>
    %160 = arith.mulf %158, %159 : vector<16x256xf32>
    %161 = vector.extract_strided_slice %145 {offsets = [0, 18], sizes = [16, 256], strides = [1, 1]} : vector<16x290xf32> to vector<16x256xf32>
    %162 = vector.broadcast %11 : vector<1x256xf32> to vector<16x256xf32>
    %163 = arith.mulf %161, %162 : vector<16x256xf32>
    %164 = vector.extract_strided_slice %145 {offsets = [0, 32], sizes = [16, 256], strides = [1, 1]} : vector<16x290xf32> to vector<16x256xf32>
    %165 = vector.broadcast %13 : vector<1x256xf32> to vector<16x256xf32>
    %166 = arith.mulf %164, %165 : vector<16x256xf32>
    %167 = vector.extract_strided_slice %145 {offsets = [0, 33], sizes = [16, 256], strides = [1, 1]} : vector<16x290xf32> to vector<16x256xf32>
    %168 = vector.broadcast %15 : vector<1x256xf32> to vector<16x256xf32>
    %169 = arith.mulf %167, %168 : vector<16x256xf32>
    %170 = vector.extract_strided_slice %145 {offsets = [0, 34], sizes = [16, 256], strides = [1, 1]} : vector<16x290xf32> to vector<16x256xf32>
    %171 = vector.broadcast %17 : vector<1x256xf32> to vector<16x256xf32>
    %172 = arith.mulf %170, %171 : vector<16x256xf32>
    %173 = tpu.concatenate %148, %151, %154, %157, %160, %163, %166, %169, %172 in 0 : vector<16x256xf32>, vector<16x256xf32>, vector<16x256xf32>, vector<16x256xf32>, vector<16x256xf32>, vector<16x256xf32>, vector<16x256xf32>, vector<16x256xf32>, vector<16x256xf32> -> vector<144x256xf32>
    %cst_52 = arith.constant dense<0.000000e+00> : vector<16x256xf32>
    %174 = tpu.matmul %144, %173, %cst_52 {dimension_numbers = #tpu.dot_dimension_numbers<[1], [0], [0], [1], [0, 0, 1, 1], [], []>} : vector<16x144xf32>, vector<144x256xf32>, vector<16x256xf32> -> vector<16x256xf32>
    %cst_53 = arith.constant dense<0.000000e+00> : vector<16xf32>
    %175 = vector.multi_reduction <add>, %174, %cst_53 [1] : vector<16x256xf32> to vector<16xf32>
    %176 = vector.shape_cast %175 : vector<16xf32> to vector<16x1xf32>
    %cst_54 = arith.constant 3.906250e-03 : f32
    %177 = vector.broadcast %cst_54 : f32 to vector<16x1xf32>
    %178 = arith.mulf %176, %177 : vector<16x1xf32>
    %c1_55 = arith.constant 1 : index
    %c0_56 = arith.constant 0 : index
    %c0_57 = arith.constant 0 : index
    %179 = vector.load %arg5[%c1_55, %c0_56, %c0_57] : memref<2x4x16xf32, #tpu.memory_space<vmem>>, vector<1x4x16xf32>
    %180 = vector.shape_cast %179 : vector<1x4x16xf32> to vector<4x16xf32>
    %cst_58 = arith.constant dense<0.000000e+00> : vector<4x1xf32>
    %181 = tpu.matmul %180, %178, %cst_58 {dimension_numbers = #tpu.dot_dimension_numbers<[1], [0], [0], [1], [0, 0, 1, 1], [], []>} : vector<4x16xf32>, vector<16x1xf32>, vector<4x1xf32> -> vector<4x1xf32>
    %cst_59 = arith.constant 0.000000e+00 : f32
    %182 = vector.broadcast %cst_59 : f32 to vector<4x1xf32>
    %183 = arith.maximumf %181, %182 : vector<4x1xf32>
    %c1_60 = arith.constant 1 : index
    %c0_61 = arith.constant 0 : index
    %c0_62 = arith.constant 0 : index
    %184 = vector.load %arg6[%c1_60, %c0_61, %c0_62] : memref<2x16x4xf32, #tpu.memory_space<vmem>>, vector<1x16x4xf32>
    %185 = vector.shape_cast %184 : vector<1x16x4xf32> to vector<16x4xf32>
    %cst_63 = arith.constant dense<0.000000e+00> : vector<16x1xf32>
    %186 = tpu.matmul %185, %183, %cst_63 {dimension_numbers = #tpu.dot_dimension_numbers<[1], [0], [0], [1], [0, 0, 1, 1], [], []>} : vector<16x4xf32>, vector<4x1xf32>, vector<16x1xf32> -> vector<16x1xf32>
    %cst_64 = arith.constant 0.000000e+00 : f32
    %187 = vector.broadcast %cst_64 : f32 to vector<16x1xf32>
    %188 = arith.subf %187, %186 : vector<16x1xf32>
    %189 = math.exp %188 : vector<16x1xf32>
    %cst_65 = arith.constant 1.000000e+00 : f32
    %190 = vector.broadcast %cst_65 : f32 to vector<16x1xf32>
    %191 = arith.addf %190, %189 : vector<16x1xf32>
    %cst_66 = arith.constant 1.000000e+00 : f32
    %192 = vector.broadcast %cst_66 : f32 to vector<16x1xf32>
    %193 = arith.divf %192, %191 : vector<16x1xf32>
    %194 = vector.broadcast %193 : vector<16x1xf32> to vector<16x256xf32>
    %195 = arith.mulf %174, %194 : vector<16x256xf32>
    %196 = arith.addf %195, %108 : vector<16x256xf32>
    %c0_67 = arith.constant 0 : index
    %c0_68 = arith.constant 0 : index
    %197 = vector.load %arg7[%c0_67, %c0_68] : memref<16x144xf32, #tpu.memory_space<vmem>>, vector<16x144xf32>
    %198 = tpu.concatenate %18, %196, %18 in 1 : vector<16x17xf32>, vector<16x256xf32>, vector<16x17xf32> -> vector<16x290xf32>
    %199 = vector.extract_strided_slice %198 {offsets = [0, 0], sizes = [16, 256], strides = [1, 1]} : vector<16x290xf32> to vector<16x256xf32>
    %200 = vector.broadcast %1 : vector<1x256xf32> to vector<16x256xf32>
    %201 = arith.mulf %199, %200 : vector<16x256xf32>
    %202 = vector.extract_strided_slice %198 {offsets = [0, 1], sizes = [16, 256], strides = [1, 1]} : vector<16x290xf32> to vector<16x256xf32>
    %203 = vector.broadcast %3 : vector<1x256xf32> to vector<16x256xf32>
    %204 = arith.mulf %202, %203 : vector<16x256xf32>
    %205 = vector.extract_strided_slice %198 {offsets = [0, 2], sizes = [16, 256], strides = [1, 1]} : vector<16x290xf32> to vector<16x256xf32>
    %206 = vector.broadcast %5 : vector<1x256xf32> to vector<16x256xf32>
    %207 = arith.mulf %205, %206 : vector<16x256xf32>
    %208 = vector.extract_strided_slice %198 {offsets = [0, 16], sizes = [16, 256], strides = [1, 1]} : vector<16x290xf32> to vector<16x256xf32>
    %209 = vector.broadcast %7 : vector<1x256xf32> to vector<16x256xf32>
    %210 = arith.mulf %208, %209 : vector<16x256xf32>
    %211 = vector.extract_strided_slice %198 {offsets = [0, 17], sizes = [16, 256], strides = [1, 1]} : vector<16x290xf32> to vector<16x256xf32>
    %212 = vector.broadcast %9 : vector<1x256xf32> to vector<16x256xf32>
    %213 = arith.mulf %211, %212 : vector<16x256xf32>
    %214 = vector.extract_strided_slice %198 {offsets = [0, 18], sizes = [16, 256], strides = [1, 1]} : vector<16x290xf32> to vector<16x256xf32>
    %215 = vector.broadcast %11 : vector<1x256xf32> to vector<16x256xf32>
    %216 = arith.mulf %214, %215 : vector<16x256xf32>
    %217 = vector.extract_strided_slice %198 {offsets = [0, 32], sizes = [16, 256], strides = [1, 1]} : vector<16x290xf32> to vector<16x256xf32>
    %218 = vector.broadcast %13 : vector<1x256xf32> to vector<16x256xf32>
    %219 = arith.mulf %217, %218 : vector<16x256xf32>
    %220 = vector.extract_strided_slice %198 {offsets = [0, 33], sizes = [16, 256], strides = [1, 1]} : vector<16x290xf32> to vector<16x256xf32>
    %221 = vector.broadcast %15 : vector<1x256xf32> to vector<16x256xf32>
    %222 = arith.mulf %220, %221 : vector<16x256xf32>
    %223 = vector.extract_strided_slice %198 {offsets = [0, 34], sizes = [16, 256], strides = [1, 1]} : vector<16x290xf32> to vector<16x256xf32>
    %224 = vector.broadcast %17 : vector<1x256xf32> to vector<16x256xf32>
    %225 = arith.mulf %223, %224 : vector<16x256xf32>
    %226 = tpu.concatenate %201, %204, %207, %210, %213, %216, %219, %222, %225 in 0 : vector<16x256xf32>, vector<16x256xf32>, vector<16x256xf32>, vector<16x256xf32>, vector<16x256xf32>, vector<16x256xf32>, vector<16x256xf32>, vector<16x256xf32>, vector<16x256xf32> -> vector<144x256xf32>
    %cst_69 = arith.constant dense<0.000000e+00> : vector<16x256xf32>
    %227 = tpu.matmul %197, %226, %cst_69 {dimension_numbers = #tpu.dot_dimension_numbers<[1], [0], [0], [1], [0, 0, 1, 1], [], []>} : vector<16x144xf32>, vector<144x256xf32>, vector<16x256xf32> -> vector<16x256xf32>
    %228 = arith.addf %227, %20 : vector<16x256xf32>
    %c0_70 = arith.constant 0 : index
    %c0_71 = arith.constant 0 : index
    %c0_72 = arith.constant 0 : index
    %229 = vector.load %arg8[%c0_70, %c0_71, %c0_72] : memref<1x16x256xf32, #tpu.memory_space<vmem>>, vector<1x16x256xf32>
    %230 = vector.shape_cast %229 : vector<1x16x256xf32> to vector<16x256xf32>
    %231 = vector.shape_cast %228 : vector<16x256xf32> to vector<1x16x256xf32>
    tpu.vector_store %arg8[%c0_70, %c0_71, %c0_72], %231 {strides = array<i32>} : memref<1x16x256xf32, #tpu.memory_space<vmem>>, vector<1x16x256xf32>,
    return
  }
  func.func @transform_0(%arg0: i32) -> (i32, i32, i32) {
    %c0_i32 = arith.constant 0 : i32
    %c0_i32_0 = arith.constant 0 : i32
    %c0_i32_1 = arith.constant 0 : i32
    return %arg0, %c0_i32, %c0_i32_0 : i32, i32, i32
  }
  func.func @transform_1(%arg0: i32) -> (i32, i32, i32) {
    %c0_i32 = arith.constant 0 : i32
    %c0_i32_0 = arith.constant 0 : i32
    %c0_i32_1 = arith.constant 0 : i32
    %c0_i32_2 = arith.constant 0 : i32
    return %c0_i32, %c0_i32_0, %c0_i32_1 : i32, i32, i32
  }
  func.func @transform_2(%arg0: i32) -> (i32, i32, i32) {
    %c0_i32 = arith.constant 0 : i32
    %c0_i32_0 = arith.constant 0 : i32
    %c0_i32_1 = arith.constant 0 : i32
    %c0_i32_2 = arith.constant 0 : i32
    return %c0_i32, %c0_i32_0, %c0_i32_1 : i32, i32, i32
  }
  func.func @transform_3(%arg0: i32) -> (i32, i32, i32) {
    %c0_i32 = arith.constant 0 : i32
    %c0_i32_0 = arith.constant 0 : i32
    %c0_i32_1 = arith.constant 0 : i32
    %c0_i32_2 = arith.constant 0 : i32
    return %c0_i32, %c0_i32_0, %c0_i32_1 : i32, i32, i32
  }
  func.func @transform_4(%arg0: i32) -> (i32, i32, i32) {
    %c0_i32 = arith.constant 0 : i32
    %c0_i32_0 = arith.constant 0 : i32
    %c0_i32_1 = arith.constant 0 : i32
    %c0_i32_2 = arith.constant 0 : i32
    return %c0_i32, %c0_i32_0, %c0_i32_1 : i32, i32, i32
  }
  func.func @transform_5(%arg0: i32) -> (i32, i32, i32) {
    %c0_i32 = arith.constant 0 : i32
    %c0_i32_0 = arith.constant 0 : i32
    %c0_i32_1 = arith.constant 0 : i32
    %c0_i32_2 = arith.constant 0 : i32
    return %c0_i32, %c0_i32_0, %c0_i32_1 : i32, i32, i32
  }
  func.func @transform_6(%arg0: i32) -> (i32, i32) {
    %c0_i32 = arith.constant 0 : i32
    %c0_i32_0 = arith.constant 0 : i32
    %c0_i32_1 = arith.constant 0 : i32
    return %c0_i32, %c0_i32_0 : i32, i32
  }
  func.func @transform_7(%arg0: i32) -> (i32, i32, i32) {
    %c0_i32 = arith.constant 0 : i32
    %c0_i32_0 = arith.constant 0 : i32
    %c0_i32_1 = arith.constant 0 : i32
    return %arg0, %c0_i32, %c0_i32_0 : i32, i32, i32
  }
}

</mosaic_0001>

<bundles_post_ra>
// kernel: tpu_custom_call.1
= control target key start
LH: loop header
LB: loop body
LE: loop exit
PB: predicated region body
PF: predicated region fallthrough
CT: control target
= control target key end

     0   :  { %s4911_s0 = inlined_call_operand.hbm [shape: f32[2,16,256], index: 0, kind: input, shape index: {}]   ;;  %s4912_s1 = inlined_call_operand.vmem [shape: f32[9,1,256], index: 1, kind: input, shape index: {}]   ;;  %s4913_s2 = inlined_call_operand.hbm [shape: f32[2,16,144], index: 2, kind: input, shape index: {}]   ;;  %s4914_s3 = inlined_call_operand.hbm [shape: f32[2,16,144], index: 3, kind: input, shape index: {}]   ;;  %s4915_s4 = inlined_call_operand.hbm [shape: f32[2,4,16], index: 4, kind: input, shape index: {}]   ;;  %s4916_s5 = inlined_call_operand.vmem [shape: f32[2,16,4], index: 5, kind: input, shape index: {}]   ;;  %s4917_s6 = inlined_call_operand.vmem [shape: f32[16,144], index: 6, kind: input, shape index: {}]   ;;  %s4918_s7 = inlined_call_operand.hbm [shape: f32[2,16,256], index: 7, kind: output, shape index: {}]  }
   0x1   :  { %4953 = sst [smem:[#allocation24_spill]] %s4913_s2 }
   0x2   :  { %12 = vsyncpa [#allocation3], 0 }
   0x3   :  { %14 = vsyncpa [#allocation3 + $0x1], 0 }
   0x4   :  { %15 = vsyncpa [#allocation6], 0 }
   0x5   :  { %16 = vsyncpa [#allocation9], 0 }
   0x6   :  { %17 = vsyncpa [#allocation4], 0 }
   0x7   :  { %19 = vsyncpa [#allocation4 + $0x1], 0  ;;  %s3374_s24 = smov 0   ;;  %s3376_s25 = smov 0  }
   0x8   :  { %s3378_s26 = smov 0   ;;  %s3380_s27 = smov 0  }
   0x9 LB: > { %s3395_s28 = sadd.s32 4294967295, %s3303_s27   ;;  %s2912_s29 = sadd.s32 4294967294, %s3303_s27   ;;  %s3303_s27 = sphi %s3380_s27, %s5006_s27   ;;  %s3299_s26 = sphi %s3378_s26, %s5005_s26   ;;  %s3295_s25 = sphi %s3376_s25, %s5004_s25   ;;  %s3291_s24 = sphi %s3374_s24, %s5003_s24  }
   0xa   : > { %p45_p0 = scmp.ne.s32.totalorder %s3295_s25, %s3291_s24  ;;  %p4919_p1 = scmp.eq.s32.totalorder %s3395_s28, 0 }
   0xb   : > { %p195_p2 = scmp.eq.s32.totalorder %s3395_s28, 1  ;;  %p201_p3 = scmp.eq.s32.totalorder %s2912_s29, 1 }
   0xc   : > { %p3404_p4 = por %p4919_p1, %p45_p0  ;;  %p2913_p5 = scmp.ge.s32.totalorder %s3303_s27, 1 }
   0xd   : > { %p3409_p6 = por %p201_p3, %p45_p0  ;;  %p208_p7 = scmp.lt.s32.totalorder %s3303_s27, 3 }
   0xe   : > { %s4954_s30 = scalar_select %p3404_p4, 1, 0 }
   0xf   : > { %s4955_s8 = scalar_select %p3409_p6, 1, 0 }
  0x10   : > { %p3414_p8 = pnand %p2913_p5, %p208_p7  ;;  %s3305_s10 = smov [#allocation5]  }
  0x11   : > { %s223_s11 = sshll.u32 %s3305_s10, 4  ;;  %s3306_s13 = smov [#allocation7]   ;;  %s224_s11 = int_to_ptr.vmem [resolvable:$true] %s223_s11 }
  0x12   : > { %s4956_s9 = scalar_select %p3414_p8, 1, 0 }
  0x13   : > { %p3014_p9 = pneg %p3414_p8  ;;  %s236_s14 = sshll.u32 %s3306_s13, 4  ;;  %s237_s14 = int_to_ptr.vmem [resolvable:$true] %s236_s14 }
  0x14   : > { %s3307_s15 = smov [#allocation8]   ;;  %s3136_s17 = scalar_lea.vmem %s224_s11, 1024 }
  0x15   : > { %p3423_p11 = pnand %p3014_p9, %p4919_p1  ;;  %s249_s16 = sshll.u32 %s3307_s15, 4  ;;  %s250_s16 = int_to_ptr.vmem [resolvable:$true] %s249_s16 }
  0x16   : > { %p3137_p13 = scmp.ne.s32.totalorder %s224_s11, %s3136_s17  ;;  %p3144_p5 = scmp.lt.s32.totalorder %s224_s11, %s224_s11 }
  0x17   : > { %p3127_p12 = pneg %p3423_p11  ;;  %p3145_p7 = scmp.lt.s32.totalorder %s3136_s17, %s3136_s17 }
  0x19   : > { %p3139_p0 = pnand %p3137_p13, %p3127_p12  ;;  %p3146_p9 = por %p3145_p7, %p3144_p5 }
  0x1b   : > { %p3140_p3 = pneg %p3139_p0 }
  0x1d   : > { %p3147_p10 = pnand %p3146_p9, %p3140_p3 }
  0x1f   : > { %3150 = shalt.err (!%p3147_p10)
}
  0x20   : > { %s4920_s18 = smov 256   ;;  %s4921_s19 = smov 16  }
  0x21   : > { %s4958_s2 = sld [smem:[#allocation24_spill]]  ;;  %s3162_s22 = scalar_lea.vmem %s237_s14, 1024 }
  0x22   : > { %p3163_p13 = scmp.ne.s32.totalorder %s237_s14, %s3162_s22  ;;  %p3170_p3 = scmp.lt.s32.totalorder %s237_s14, %s237_s14 }
  0x23   : > { %p3171_p10 = scmp.lt.s32.totalorder %s3162_s22, %s3162_s22 }
  0x24   : > { %p3165_p0 = pnand %p3163_p13, %p3127_p12 }
  0x25   : > { %p3172_p7 = por %p3171_p10, %p3170_p3 }
  0x26   : > { %p3166_p5 = pneg %p3165_p0 }
  0x27   : > { %3017 = dma.hbm_to_vmem [thread:$0]  (!%p3423_p11), %s4958_s2, 1024, %s224_s11, [#allocation6], %s4920_s18, %s4920_s18, %s4921_s19  }
  0x28   : > { %p3173_p9 = pnand %p3172_p7, %p3166_p5 }
  0x2a   : > { %3176 = shalt.err (!%p3173_p9)
}
  0x2b   : > { %3020 = dma.hbm_to_vmem [thread:$0]  (!%p3423_p11), %s4914_s3, 1024, %s237_s14, [#allocation6], %s4920_s18, %s4920_s18, %s4921_s19  }
  0x2c   : > { %s3188_s10 = scalar_lea.vmem %s250_s16, 128  ;;  %p3196_p3 = scmp.lt.s32.totalorder %s250_s16, %s250_s16 }
  0x2d   : > { %p3189_p1 = scmp.ne.s32.totalorder %s250_s16, %s3188_s10  ;;  %p3197_p5 = scmp.lt.s32.totalorder %s3188_s10, %s3188_s10 }
  0x2f   : > { %p3191_p13 = pnand %p3189_p1, %p3127_p12  ;;  %p3198_p10 = por %p3197_p5, %p3196_p3 }
  0x31   : > { %p3192_p0 = pneg %p3191_p13 }
  0x33   : > { %p3199_p7 = pnand %p3198_p10, %p3192_p0 }
  0x35   : > { %3202 = shalt.err (!%p3199_p7)
}
  0x36   : > { %s3310_s11 = smov 64   ;;  %s3311_s13 = smov 4  }
  0x37   : > { %3023 = dma.hbm_to_vmem [thread:$0]  (!%p3423_p11), %s4915_s4, 128, %s250_s16, [#allocation9], %s3310_s11, %s3310_s11, %s3311_s13  }
  0x38   : > { %s3460_s17 = sadd.s32 1, %s3303_s27   ;;  %s32_s21 = sadd.s32 1, %s3299_s26 }
  0x39   : > { %s29_s20 = ssub.s32 %s3303_s27, %s3460_s17  ;;  %p39_p12 = scmp.ne.s32.totalorder %s3299_s26, %s3295_s25 }
  0x3a   : > { %p30_p1 = scmp.eq.s32.totalorder %s29_s20, 0  ;;  %p40_p9 = scmp.eq.s32.totalorder %s3303_s27, 0 }
  0x3b   : > { %p3035_p13 = scmp.lt.s32.totalorder %s3303_s27, 2  ;;  %p3474_p3 = por %p195_p2, %p39_p12 }
  0x3c   : > { %s3470_s22 = scalar_select %p30_p1, %s3299_s26, %s32_s21  }
  0x3d   : > { %p41_p0 = por %p40_p9, %p39_p12  ;;  %s269_s12 = sand.u32 1, %s3299_s26  }
  0x3e   : > { %s4959_s23 = scalar_select %p3474_p3, 1, 0 }
  0x3f   : > { %s2960_s29 = sshll.u32 %s3303_s27, 9  ;;  %s2918_s16 = sshll.u32 %s269_s12, 5 }
  0x40   : > { %s3483_s13 = scalar_lea.hbm %s4911_s0, %s2960_s29  ;;  %s273_s14 = scalar_lea.vmem [#allocation2], %s2918_s16 }
  0x41   : > { %s280_s15 = sshll.u32 %s273_s14, 4  ;;  %p3485_p11 = pnand %p3035_p13, %p41_p0  ;;  %s3489_s15 = int_to_ptr.vmem [resolvable:$true] %s280_s15 }
  0x42   : > { %s3491_s21 = scalar_lea.sflag [#allocation3], %s269_s12  ;;  %s3203_s18 = scalar_lea.hbm %s3483_s13, 512 }
  0x43   : > { %p3204_p2 = scmp.ne.s32.totalorder %s3483_s13, %s3203_s18  ;;  %p3205_p5 = pneg %p3485_p11 }
  0x44   : > { %s3208_s16 = scalar_lea.hbm %s4911_s0, 1024  ;;  %p3209_p1 = scmp.lt.s32.totalorder %s3483_s13, %s4911_s0 }
  0x45   : > { %p3206_p10 = pnand %p3205_p5, %p3204_p2  ;;  %p3210_p12 = scmp.lt.s32.totalorder %s3208_s16, %s3203_s18 }
  0x47   : > { %p3207_p7 = pneg %p3206_p10  ;;  %p3211_p9 = por %p3210_p12, %p3209_p1 }
  0x49   : > { %p3212_p13 = pnand %p3211_p9, %p3207_p7 }
  0x4b   : > { %3215 = shalt.err (!%p3212_p13)
}
  0x4c   : > { %s3216_s12 = scalar_lea.vmem %s3489_s15, 512  ;;  %s3312_s19 = smov [#allocation2]  }
  0x4d   : > { %p3217_p0 = scmp.ne.s32.totalorder %s3489_s15, %s3216_s12  ;;  %s3221_s2 = sshll.u32 %s3312_s19, 4  ;;  %s3222_s2 = int_to_ptr.vmem [resolvable:$false] %s3221_s2 }
  0x4e   : > { %s3223_s29 = scalar_lea.vmem %s3222_s2, 1024  ;;  %p3224_p10 = scmp.lt.s32.totalorder %s3489_s15, %s3222_s2 }
  0x4f   : > { %p3219_p6 = pnand %p3217_p0, %p3205_p5  ;;  %p3225_p3 = scmp.lt.s32.totalorder %s3223_s29, %s3216_s12 }
  0x51   : > { %p3220_p2 = pneg %p3219_p6  ;;  %p3226_p4 = por %p3225_p3, %p3224_p10 }
  0x53   : > { %p3227_p8 = pnand %p3226_p4, %p3220_p2 }
  0x55   : > { %3230 = shalt.err (!%p3227_p8)
}
  0x56   : > { %s4961_s18 = smov 16   ;;  %s4962_s10 = smov 256  }
  0x57   : > { %3027 = dma.hbm_to_vmem [thread:$0]  (!%p3485_p11), %s3483_s13, 512, %s3489_s15, %s3491_s21, %s4962_s10, %s4962_s10, %s4961_s18  }
  0x58   : > { %p4963_p6 = scmp.ne.s32.totalorder %s4956_s9, 0 }
  0x5a   : > { %292 = sbr.rel (%p4963_p6) target bundleno = 4164 (0x1044), region = 48 }
  0x5f   : > { %s3518_s19 = sand.u32 1, %s3295_s25   ;;  %p4964_p4 = scmp.ne.s32.totalorder %s4954_s30, 0 }
  0x60   : > { %s4941_s2 = sshll.u32 %s3518_s19, 5  ;;  %s295_s16 = scalar_lea.sflag [#allocation3], %s3518_s19 }
  0x61   : > { %s3524_s20 = scalar_lea.vmem [#allocation2], %s4941_s2 }
  0x62   : > { %3274 = dma.done.wait (%p4964_p4), %s295_s16, 512  }
  0x63   : > { %3276 = vsyncadd (%p4964_p4), %s295_s16, 4294966784  ;;  %p4965_p8 = scmp.eq.s32.totalorder %s3395_s28, 0 }
  0x65   : > { %3278 = dma.done.wait (%p4965_p8), [#allocation6], 2048   ;;  %p4966_p3 = pmov %p4965_p8 }
  0x67   : > { %3280 = vsyncadd (%p4966_p3), [#allocation6], 4294965248  ;;  %p4967_p11 = pmov %p4966_p3 }
  0x68   : > { %p4968_p5 = pmov %p4966_p3 }
  0x69   : > { %3282 = dma.done.wait (%p4967_p11), [#allocation9], 128  }
  0x6a   : > { %3284 = vsyncadd (%p4968_p5), [#allocation9], 4294967168  ;;  %v392_v0 = vlaneseq  ;;  %v360_v3 = vld [vmem:[%s3524_s20 + $0x10] sm:$0xff]  ;;  %v359_v4 = vld [vmem:[%s3524_s20 + $0x8] sm:$0xff]  ;;  %s3313_s30 = smov 17   ;;  %s3314_s15 = smov 33  }
  0x6b   : > { %374 = vrot.lane.b32.xlu0 %v360_v3, %s3313_s30  ;;  %372 = vrot.lane.b32.xlu1 %v359_v4, %s3313_s30  ;;  %v2933_v5 = vld [vmem:[%s4912_s1 + $0xe] sm:$0x3]  ;;  %v361_v7 = vld [vmem:[%s3524_s20 + $0x18] sm:$0xff]  ;;  %s3315_s29 = smov 32   ;;  %s3316_s16 = smov 18   ;;  %vm378_vm0 = vcmask 138240  }
  0x6c   : > { %v393_v1 = vshrl.u32 %v392_v0, 7  ;;  %v358_v10 = vld [vmem:[%s3524_s20] sm:$0xff]  ;;  %v2932_v11 = vld [vmem:[%s4912_s1 + $0xc] sm:$0x3]  ;;  %v2931_v14 = vld [vmem:[%s4912_s1 + $0xa] sm:$0x3] }
  0x6d   : > { %v2930_v17 = vld [vmem:[%s4912_s1 + $0x8] sm:$0x3]  ;;  %v2929_v20 = vld [vmem:[%s4912_s1 + $0x6] sm:$0x3]  ;;  %v2928_v23 = vld [vmem:[%s4912_s1 + $0x4] sm:$0x3] }
  0x6e   : > { %v3538_v2 = vsub.s32 0, %v393_v1  ;;  %v3547_v6 = vsub.s32 1, %v393_v1  ;;  %s4940_s11 = smov 16   ;;  %v2927_v26 = vld [vmem:[%s4912_s1 + $0x2] sm:$0x3]  ;;  %s3320_s9 = smov 34  }
  0x6f   : > { %376 = vrot.lane.b32.xlu0 %v361_v7, %s3313_s30  ;;  %v2934_v29 = vld [vmem:[%s4912_s1 + $0x10] sm:$0x3]  ;;  %s3321_s13 = smov 95   ;;  %s3323_s21 = smov 110   ;;  %vm562_vm1 = vcmask 269312   ;;  %vm538_vm2 = vcmask 261120  }
  0x70   : > { %v553_v8 = vrot.slane %v2933_v5, %v3538_v2  ;;  %v557_v9 = vrot.slane %v2933_v5, %v3547_v6  ;;  %v533_v12 = vrot.slane %v2932_v11, %v3547_v6  ;;  %v529_v13 = vrot.slane %v2932_v11, %v3538_v2  ;;  %s3324_s14 = smov 111   ;;  %s3325_s12 = smov 112  }
  0x71   : > { %v509_v15 = vrot.slane %v2931_v14, %v3547_v6  ;;  %v505_v16 = vrot.slane %v2931_v14, %v3538_v2  ;;  %v486_v18 = vrot.slane %v2930_v17, %v3547_v6  ;;  %v482_v19 = vrot.slane %v2930_v17, %v3538_v2  ;;  %s3327_s18 = smov 127   ;;  %s3328_s10 = smov 94  }
  0x72   : > { %558 = vrot.lane.b32.xlu1 %v553_v8, %s3314_s15  ;;  %v462_v21 = vrot.slane %v2929_v20, %v3547_v6  ;;  %v458_v22 = vrot.slane %v2929_v20, %v3538_v2  ;;  %v438_v24 = vrot.slane %v2928_v23, %v3547_v6  ;;  %v434_v25 = vrot.slane %v2928_v23, %v3538_v2  ;;  %p4999_p1 = scmp.ne.s32.totalorder %s4959_s23, 0 }
  0x73   : > { %370 = vrot.lane.b32.xlu0 %v358_v10, %s3313_s30  ;;  %v414_v27 = vrot.slane %v2927_v26, %v3547_v6  ;;  %v410_v28 = vrot.slane %v2927_v26, %v3538_v2  ;;  %v581_v30 = vrot.slane %v2934_v29, %v3547_v6  ;;  %v577_v31 = vrot.slane %v2934_v29, %v3538_v2 }
  0x74   : > { %vm514_vm3 = vcmask 146432   ;;  %vm467_vm4 = vcmask 130048   ;;  %vm443_vm5 = vcmask 15360   ;;  %vm419_vm6 = vcmask 7168  }
  0x75   : > { %vm586_vm7 = vcmask 277504   ;;  %vm777_vm8 = vcmask 777216   ;;  %vm750_vm9 = vcmask 785408   ;;  %vm723_vm10 = vcmask 900096  }
  0x76   : > { %560 = vrot.lane.b32.xlu1 %v557_v9, %s3314_s15  ;;  %s3322_s15 = smov 96   ;;  %vm696_vm11 = vcmask 908288   ;;  %vm669_vm12 = vcmask 916480   ;;  %vm642_vm13 = vcmask 1031168   ;;  %vm615_vm14 = vcmask 1039360  }
  0x77   : > { %534 = vrot.lane.b32.xlu0 %v529_v13, %s3315_s29  ;;  %vm804_vm15 = vcmask 769024  }
  0x7a   : > { %536 = vrot.lane.b32.xlu1 %v533_v12, %s3315_s29  ;;  %s3318_s29 = smov 2  }
  0x7b   : > { %510 = vrot.lane.b32.xlu0 %v505_v16, %s3316_s16 }
  0x7e   : > { %512 = vrot.lane.b32.xlu1 %v509_v15, %s3316_s16  ;;  %s3319_s16 = smov 1  }
  0x7f   : > { %487 = vrot.lane.b32.xlu0 %v482_v19, %s3313_s30 }
  0x82   : > { %489 = vrot.lane.b32.xlu1 %v486_v18, %s3313_s30 }
  0x83   : > { %463 = vrot.lane.b32.xlu0 %v458_v22, %s4940_s11 }
  0x86   : > { %465 = vrot.lane.b32.xlu1 %v462_v21, %s4940_s11 }
  0x87   : > { %439 = vrot.lane.b32.xlu0 %v434_v25, %s3318_s29 }
  0x8a   : > { %441 = vrot.lane.b32.xlu1 %v438_v24, %s3318_s29  ;;  %s3326_s29 = smov 126  }
  0x8b   : > { %415 = vrot.lane.b32.xlu0 %v410_v28, %s3319_s16 }
  0x8e   : > { %417 = vrot.lane.b32.xlu1 %v414_v27, %s3319_s16  ;;  %s2961_s16 = sshll.u32 %s3395_s28, 9 }
  0x8f   : > { %582 = vrot.lane.b32.xlu0 %v577_v31, %s3320_s9 }
  0x92   : > { %584 = vrot.lane.b32.xlu1 %v581_v30, %s3320_s9 }
  0xdd   : > { %v3594_v32 = vpop.permute.xlu0 %374  ;;  %v3596_v33 = vpop.permute.xlu1 %372 }
  0xde   : > { %v3600_v34 = vsel %vm378_vm0, 0.0, %v3594_v32  ;;  %v3615_v39 = vsel %vm378_vm0, %v3596_v33, 0.0 }
  0xe1   : > { %v3602_v35 = vpop.permute.xlu0 %376 }
  0xe2   : > { %v3610_v38 = vsel %vm378_vm0, %v3602_v35, 0.0  ;;  %v3734_v20 = vsel %vm378_vm0, %v3594_v32, %v3602_v35 }
  0xe4   : > { %v3604_v36 = vpop.permute.xlu1 %558 }
  0xe5   : > { %v570_v37 = vmul.f32 %v3604_v36, %v3600_v34  ;;  %v3617_v40 = vpop.permute.xlu0 %370 }
  0xe6   : > { %v3627_v44 = vsel %vm378_vm0, 0.0, %v3617_v40  ;;  %v3743_v23 = vsel %vm378_vm0, %v3617_v40, %v3596_v33 }
  0xe7   : > { %771 = vrot.lane.b32.xlu0 %v570_v37, %s3321_s13  ;;  %v567_v46 = vmul.f32 %v3604_v36, %v3627_v44 }
  0xe8   : > { %v3619_v41 = vpop.permute.xlu1 %560 }
  0xe9   : > { %v572_v42 = vmul.f32 %v3619_v41, %v3610_v38  ;;  %v569_v43 = vmul.f32 %v3619_v41, %v3615_v39  ;;  %v3631_v45 = vpop.permute.xlu0 %534  ;;  %v3727_v19 = vsel %vm562_vm1, %v3604_v36, %v3619_v41  ;;  %vm3330_vm1 = vmmov 0  }
  0xea   : > { %v546_v47 = vmul.f32 %v3631_v45, %v3600_v34  ;;  %v543_v52 = vmul.f32 %v3631_v45, %v3627_v44  ;;  %v571_v21 = vmul.f32 %v3727_v19, %v3734_v20  ;;  %v568_v26 = vmul.f32 %v3727_v19, %v3743_v23 }
  0xeb   : > { %775 = vrot.lane.b32.xlu1 %v572_v42, %s3321_s13  ;;  %769 = vrot.lane.b32.xlu0 %v569_v43, %s3321_s13 }
  0xec   : > { %v3637_v48 = vpop.permute.xlu1 %536 }
  0xed   : > { %v548_v49 = vmul.f32 %v3637_v48, %v3610_v38  ;;  %v545_v50 = vmul.f32 %v3637_v48, %v3615_v39  ;;  %v3645_v51 = vpop.permute.xlu0 %510  ;;  %v3747_v24 = vsel %vm538_vm2, %v3631_v45, %v3637_v48  ;;  %vm1356_vm2 = vcmask 31744  }
  0xee   : > { %v522_v53 = vmul.f32 %v3645_v51, %v3600_v34  ;;  %v519_v58 = vmul.f32 %v3645_v51, %v3627_v44  ;;  %v547_v25 = vmul.f32 %v3747_v24, %v3734_v20  ;;  %v544_v29 = vmul.f32 %v3747_v24, %v3743_v23 }
  0xef   : > { %765 = vrot.lane.b32.xlu1 %v567_v46, %s3321_s13  ;;  %744 = vrot.lane.b32.xlu0 %v546_v47, %s3322_s15 }
  0xf0   : > { %v3653_v54 = vpop.permute.xlu1 %512 }
  0xf1   : > { %v524_v55 = vmul.f32 %v3653_v54, %v3610_v38  ;;  %v521_v56 = vmul.f32 %v3653_v54, %v3615_v39  ;;  %v3661_v57 = vpop.permute.xlu0 %487  ;;  %v3757_v27 = vsel %vm514_vm3, %v3645_v51, %v3653_v54  ;;  %vm1363_vm3 = vcmask 1043456  }
  0xf2   : > { %v498_v59 = vmul.f32 %v3661_v57, %v3600_v34  ;;  %v495_v0 = vmul.f32 %v3661_v57, %v3627_v44  ;;  %v523_v28 = vmul.f32 %v3757_v27, %v3734_v20  ;;  %v520_v32 = vmul.f32 %v3757_v27, %v3743_v23 }
  0xf3   : > { %748 = vrot.lane.b32.xlu1 %v548_v49, %s3322_s15  ;;  %742 = vrot.lane.b32.xlu0 %v545_v50, %s3322_s15 }
  0xf4   : > { %v3669_v60 = vpop.permute.xlu1 %489 }
  0xf5   : > { %v500_v61 = vmul.f32 %v3669_v60, %v3610_v38  ;;  %v497_v62 = vmul.f32 %v3669_v60, %v3615_v39  ;;  %v3677_v63 = vpop.permute.xlu0 %463  ;;  %v3768_v30 = vsel %vm378_vm0, %v3661_v57, %v3669_v60 }
  0xf6   : > { %v475_v1 = vmul.f32 %v3677_v63, %v3600_v34  ;;  %v472_v8 = vmul.f32 %v3677_v63, %v3627_v44  ;;  %v499_v31 = vmul.f32 %v3768_v30, %v3734_v20  ;;  %v496_v37 = vmul.f32 %v3768_v30, %v3743_v23 }
  0xf7   : > { %738 = vrot.lane.b32.xlu1 %v543_v52, %s3322_s15  ;;  %717 = vrot.lane.b32.xlu0 %v522_v53, %s3323_s21 }
  0xf8   : > { %v3685_v3 = vpop.permute.xlu1 %465 }
  0xf9   : > { %v477_v4 = vmul.f32 %v3685_v3, %v3610_v38  ;;  %v474_v5 = vmul.f32 %v3685_v3, %v3615_v39  ;;  %v3693_v7 = vpop.permute.xlu0 %439  ;;  %v3779_v33 = vsel %vm467_vm4, %v3677_v63, %v3685_v3 }
  0xfa   : > { %4969 = vst [vmem:[#allocation15_spill] sm:$0xff] %v3693_v7  ;;  %v451_v9 = vmul.f32 %v3693_v7, %v3600_v34  ;;  %v448_v14 = vmul.f32 %v3693_v7, %v3627_v44  ;;  %v476_v35 = vmul.f32 %v3779_v33, %v3734_v20  ;;  %v473_v43 = vmul.f32 %v3779_v33, %v3743_v23 }
  0xfb   : > { %721 = vrot.lane.b32.xlu1 %v524_v55, %s3323_s21  ;;  %715 = vrot.lane.b32.xlu0 %v521_v56, %s3323_s21 }
  0xfc   : > { %v3701_v10 = vpop.permute.xlu1 %441 }
  0xfd   : > { %v453_v11 = vmul.f32 %v3701_v10, %v3610_v38  ;;  %v450_v12 = vmul.f32 %v3701_v10, %v3615_v39  ;;  %v3709_v13 = vpop.permute.xlu0 %415  ;;  %v3789_v40 = vsel %vm443_vm5, %v3693_v7, %v3701_v10 }
  0xfe   : > { %4970 = vst [vmem:[#allocation16_spill] sm:$0xff] %v3709_v13  ;;  %v427_v15 = vmul.f32 %v3709_v13, %v3600_v34  ;;  %v424_v22 = vmul.f32 %v3709_v13, %v3627_v44  ;;  %v452_v42 = vmul.f32 %v3789_v40, %v3734_v20  ;;  %v449_v47 = vmul.f32 %v3789_v40, %v3743_v23 }
  0xff   : > { %711 = vrot.lane.b32.xlu1 %v519_v58, %s3323_s21  ;;  %690 = vrot.lane.b32.xlu0 %v498_v59, %s3324_s14  ;;  %v363_v58 = vld [vmem:[#allocation5 + $0x8] sm:$0xff] }
 0x100   : > { %v3717_v16 = vpop.permute.xlu1 %417  ;;  %2935 = vmatprep.mubr.msk.f32.mxu0 %vm467_vm4, %v363_v58 }
 0x101   : > { %v429_v17 = vmul.f32 %v3717_v16, %v3610_v38  ;;  %v426_v18 = vmul.f32 %v3717_v16, %v3615_v39  ;;  %v3799_v46 = vsel %vm419_vm6, %v3709_v13, %v3717_v16  ;;  %v3807_v50 = vpop.permute.xlu0 %582 }
 0x102   : > { %4971 = vst [vmem:[#allocation17_spill] sm:$0xff] %v3799_v46  ;;  %v428_v49 = vmul.f32 %v3799_v46, %v3734_v20  ;;  %4972 = vst [vmem:[#allocation18_spill] sm:$0xff] %v3807_v50  ;;  %v425_v53 = vmul.f32 %v3799_v46, %v3743_v23  ;;  %v594_v55 = vmul.f32 %v3807_v50, %v3600_v34 }
 0x103   : > { %694 = vrot.lane.b32.xlu1 %v500_v61, %s3324_s14  ;;  %688 = vrot.lane.b32.xlu0 %v497_v62, %s3324_s14 }
 0x104   : > { %v3809_v52 = vpop.permute.xlu1 %584 }
 0x105   : > { %4973 = vst [vmem:[#allocation19_spill] sm:$0xff] %v3809_v52  ;;  %v3819_v56 = vsel %vm586_vm7, %v3807_v50, %v3809_v52  ;;  %v596_v59 = vmul.f32 %v3809_v52, %v3610_v38  ;;  %v593_v62 = vmul.f32 %v3809_v52, %v3615_v39  ;;  %v591_v38 = vmul.f32 %v3807_v50, %v3627_v44 }
 0x106   : > { %4974 = vst [vmem:[#allocation20_spill] sm:$0xff] %v3819_v56  ;;  %v595_v61 = vmul.f32 %v3819_v56, %v3734_v20 }
 0x107   : > { %684 = vrot.lane.b32.xlu1 %v495_v0, %s3324_s14  ;;  %663 = vrot.lane.b32.xlu0 %v475_v1, %s3325_s12  ;;  %v592_v0 = vmul.f32 %v3819_v56, %v3743_v23 }
 0x10b   : > { %667 = vrot.lane.b32.xlu1 %v477_v4, %s3325_s12  ;;  %661 = vrot.lane.b32.xlu0 %v474_v5, %s3325_s12 }
 0x10f   : > { %657 = vrot.lane.b32.xlu1 %v472_v8, %s3325_s12  ;;  %636 = vrot.lane.b32.xlu0 %v451_v9, %s3326_s29 }
 0x113   : > { %640 = vrot.lane.b32.xlu1 %v453_v11, %s3326_s29  ;;  %634 = vrot.lane.b32.xlu0 %v450_v12, %s3326_s29 }
 0x117   : > { %630 = vrot.lane.b32.xlu1 %v448_v14, %s3326_s29  ;;  %609 = vrot.lane.b32.xlu0 %v427_v15, %s3327_s18 }
 0x11b   : > { %613 = vrot.lane.b32.xlu1 %v429_v17, %s3327_s18  ;;  %607 = vrot.lane.b32.xlu0 %v426_v18, %s3327_s18 }
 0x11f   : > { %773 = vrot.lane.b32.xlu0 %v571_v21, %s3321_s13  ;;  %603 = vrot.lane.b32.xlu1 %v424_v22, %s3327_s18 }
 0x123   : > { %746 = vrot.lane.b32.xlu0 %v547_v25, %s3322_s15  ;;  %767 = vrot.lane.b32.xlu1 %v568_v26, %s3321_s13 }
 0x127   : > { %719 = vrot.lane.b32.xlu0 %v523_v28, %s3323_s21  ;;  %740 = vrot.lane.b32.xlu1 %v544_v29, %s3322_s15 }
 0x12b   : > { %692 = vrot.lane.b32.xlu0 %v499_v31, %s3324_s14  ;;  %713 = vrot.lane.b32.xlu1 %v520_v32, %s3323_s21 }
 0x12f   : > { %665 = vrot.lane.b32.xlu0 %v476_v35, %s3325_s12  ;;  %686 = vrot.lane.b32.xlu1 %v496_v37, %s3324_s14 }
 0x133   : > { %638 = vrot.lane.b32.xlu0 %v452_v42, %s3326_s29  ;;  %659 = vrot.lane.b32.xlu1 %v473_v43, %s3325_s12 }
 0x137   : > { %632 = vrot.lane.b32.xlu1 %v449_v47, %s3326_s29  ;;  %611 = vrot.lane.b32.xlu0 %v428_v49, %s3327_s18 }
 0x13b   : > { %605 = vrot.lane.b32.xlu1 %v425_v53, %s3327_s18  ;;  %798 = vrot.lane.b32.xlu0 %v594_v55, %s3328_s10 }
 0x13f   : > { %802 = vrot.lane.b32.xlu1 %v596_v59, %s3328_s10  ;;  %800 = vrot.lane.b32.xlu0 %v595_v61, %s3328_s10 }
 0x143   : > { %796 = vrot.lane.b32.xlu0 %v593_v62, %s3328_s10  ;;  %794 = vrot.lane.b32.xlu1 %v592_v0, %s3328_s10 }
 0x147   : > { %792 = vrot.lane.b32.xlu1 %v591_v38, %s3328_s10 }
 0x159   : > { %v772_v1 = vpop.permute.xlu0 %771 }
 0x15d   : > { %v776_v4 = vpop.permute.xlu1 %775  ;;  %v770_v5 = vpop.permute.xlu0 %769 }
 0x161   : > { %v766_v8 = vpop.permute.xlu1 %765  ;;  %v745_v9 = vpop.permute.xlu0 %744 }
 0x165   : > { %v749_v11 = vpop.permute.xlu1 %748  ;;  %v743_v12 = vpop.permute.xlu0 %742 }
 0x169   : > { %v739_v39 = vpop.permute.xlu1 %738  ;;  %v718_v14 = vpop.permute.xlu0 %717 }
 0x16d   : > { %v722_v15 = vpop.permute.xlu1 %721  ;;  %v716_v17 = vpop.permute.xlu0 %715 }
 0x171   : > { %v712_v18 = vpop.permute.xlu1 %711  ;;  %v691_v21 = vpop.permute.xlu0 %690 }
 0x175   : > { %v695_v22 = vpop.permute.xlu1 %694  ;;  %v689_v25 = vpop.permute.xlu0 %688 }
 0x179   : > { %v685_v26 = vpop.permute.xlu1 %684  ;;  %v3839_v28 = vpop.permute.xlu0 %663 }
 0x17d   : > { %v668_v29 = vpop.permute.xlu1 %667  ;;  %v3841_v31 = vpop.permute.xlu0 %661 }
 0x181   : > { %v3843_v32 = vpop.permute.xlu1 %657  ;;  %v3845_v35 = vpop.permute.xlu0 %636 }
 0x185   : > { %v3847_v37 = vpop.permute.xlu1 %640  ;;  %v3849_v42 = vpop.permute.xlu0 %634 }
 0x189   : > { %v3851_v43 = vpop.permute.xlu1 %630  ;;  %v3853_v47 = vpop.permute.xlu0 %609 }
 0x18d   : > { %v3855_v49 = vpop.permute.xlu1 %613  ;;  %v3857_v53 = vpop.permute.xlu0 %607 }
 0x191   : > { %v3859_v55 = vpop.permute.xlu1 %603  ;;  %v774_v58 = vpop.permute.xlu0 %773 }
 0x192   : > { %v781_v59 = vsel %vm777_vm8, %v774_v58, %v776_v4  ;;  %v780_v61 = vsel %vm777_vm8, %v772_v1, %v774_v58 }
 0x193   : > { %819 = vmatprep.subr.mxu0 %v781_v59 }
 0x194   : > { %820 = vmatpush1.msra.mxu0 %v780_v61 }
 0x195   : > { %v768_v62 = vpop.permute.xlu1 %767  ;;  %v747_v0 = vpop.permute.xlu0 %746 }
 0x196   : > { %v779_v38 = vsel %vm777_vm8, %v768_v62, %v770_v5  ;;  %v778_v52 = vsel %vm777_vm8, %v766_v8, %v768_v62  ;;  %v754_v50 = vsel %vm750_vm9, %v747_v0, %v749_v11  ;;  %v753_v4 = vsel %vm750_vm9, %v745_v9, %v747_v0 }
 0x197   : > { %821 = vmatprep.subr.mxu0 %v779_v38 }
 0x198   : > { %822 = vmatpush1.msra.mxu0 %v778_v52 }
 0x199   : > { %v741_v56 = vpop.permute.xlu1 %740  ;;  %823 = vmatprep.subr.mxu0 %v754_v50  ;;  %v720_v46 = vpop.permute.xlu0 %719 }
 0x19a   : > { %824 = vmatpush1.msra.mxu0 %v753_v4  ;;  %v752_v1 = vsel %vm750_vm9, %v741_v56, %v743_v12  ;;  %v751_v58 = vsel %vm750_vm9, %v739_v39, %v741_v56  ;;  %v727_v5 = vsel %vm723_vm10, %v720_v46, %v722_v15  ;;  %v726_v11 = vsel %vm723_vm10, %v718_v14, %v720_v46 }
 0x19b   : > { %825 = vmatprep.subr.mxu0 %v752_v1 }
 0x19c   : > { %826 = vmatpush1.msra.mxu0 %v751_v58 }
 0x19d   : > { %v714_v8 = vpop.permute.xlu1 %713  ;;  %827 = vmatprep.subr.mxu0 %v727_v5  ;;  %v693_v52 = vpop.permute.xlu0 %692 }
 0x19e   : > { %828 = vmatpush1.msra.mxu0 %v726_v11  ;;  %v725_v50 = vsel %vm723_vm10, %v714_v8, %v716_v17  ;;  %v724_v9 = vsel %vm723_vm10, %v712_v18, %v714_v8  ;;  %v700_v12 = vsel %vm696_vm11, %v693_v52, %v695_v22  ;;  %v699_v15 = vsel %vm696_vm11, %v691_v21, %v693_v52 }
 0x19f   : > { %829 = vmatprep.subr.mxu0 %v725_v50  ;;  %v365_v50 = vld [vmem:[#allocation5 + $0x18] sm:$0xff] }
 0x1a0   : > { %830 = vmatpush1.msra.mxu0 %v724_v9 }
 0x1a1   : > { %v687_v56 = vpop.permute.xlu1 %686  ;;  %831 = vmatprep.subr.mxu0 %v700_v12  ;;  %v666_v39 = vpop.permute.xlu0 %665 }
 0x1a2   : > { %832 = vmatpush1.msra.mxu0 %v699_v15  ;;  %v698_v59 = vsel %vm696_vm11, %v687_v56, %v689_v25  ;;  %v697_v46 = vsel %vm696_vm11, %v685_v26, %v687_v56  ;;  %v673_v14 = vsel %vm669_vm12, %v666_v39, %v668_v29  ;;  %v672_v22 = vsel %vm669_vm12, %v3839_v28, %v666_v39  ;;  %v341_v29 = vld [vmem:[%s4912_s1] sm:$0x3] }
 0x1a3   : > { %833 = vmatprep.subr.mxu0 %v698_v59  ;;  %v3901_v38 = vrot.slane %v341_v29, %v3538_v2 }
 0x1a4   : > { %834 = vmatpush1.msra.mxu0 %v697_v46 }
 0x1a5   : > { %v660_v17 = vpop.permute.xlu1 %659  ;;  %835 = vmatprep.subr.mxu0 %v673_v14  ;;  %v639_v18 = vpop.permute.xlu0 %638  ;;  %v404_v2 = vmul.f32 %v3901_v38, %v3600_v34 }
 0x1a6   : > { %836 = vmatpush1.msra.mxu0 %v672_v22  ;;  %v671_v21 = vsel %vm669_vm12, %v660_v17, %v3841_v31  ;;  %v670_v25 = vsel %vm669_vm12, %v3843_v32, %v660_v17  ;;  %v646_v26 = vsel %vm642_vm13, %v639_v18, %v3847_v37  ;;  %v645_v62 = vsel %vm642_vm13, %v3845_v35, %v639_v18 }
 0x1a7   : > { %837 = vmatprep.subr.mxu0 %v671_v21  ;;  %v3896_v37 = vrot.slane %v341_v29, %v3547_v6 }
 0x1a8   : > { %838 = vmatpush1.msra.mxu0 %v670_v25 }
 0x1a9   : > { %v633_v61 = vpop.permute.xlu1 %632  ;;  %839 = vmatprep.subr.mxu0 %v646_v26  ;;  %v612_v28 = vpop.permute.xlu0 %611 }
 0x1aa   : > { %840 = vmatpush1.msra.mxu0 %v645_v62  ;;  %v644_v31 = vsel %vm642_vm13, %v633_v61, %v3849_v42  ;;  %v643_v32 = vsel %vm642_vm13, %v3851_v43, %v633_v61  ;;  %v619_v0 = vsel %vm615_vm14, %v612_v28, %v3855_v49  ;;  %v618_v42 = vsel %vm615_vm14, %v3853_v47, %v612_v28 }
 0x1ab   : > { %841 = vmatprep.subr.mxu0 %v644_v31  ;;  %v405_v49 = vmul.f32 %v3896_v37, %v3734_v20  ;;  %v403_v47 = vmul.f32 %v3896_v37, %v3743_v23  ;;  %v362_v23 = vld [vmem:[#allocation5] sm:$0xff] }
 0x1ac   : > { %842 = vmatpush1.msra.mxu0 %v643_v32 }
 0x1ad   : > { %v606_v35 = vpop.permute.xlu1 %605  ;;  %843 = vmatprep.subr.mxu0 %v619_v0  ;;  %v799_v4 = vpop.permute.xlu0 %798 }
 0x1ae   : > { %844 = vmatpush1.msra.mxu0 %v618_v42  ;;  %v617_v43 = vsel %vm615_vm14, %v606_v35, %v3857_v53  ;;  %v616_v6 = vsel %vm615_vm14, %v3859_v55, %v606_v35  ;;  %v402_v53 = vmul.f32 %v3901_v38, %v3627_v44  ;;  %v364_v44 = vld [vmem:[#allocation5 + $0x10] sm:$0xff] }
 0x1af   : > { %845 = vmatprep.subr.mxu0 %v617_v43 }
 0x1b0   : > { %846 = vmatpush1.msra.mxu0 %v616_v6 }
 0x1b1   : > { %v803_v1 = vpop.permute.xlu1 %802  ;;  %v801_v58 = vpop.permute.xlu0 %800  ;;  %847 = vmatprep.subr.mxu0 %v405_v49 }
 0x1b2   : > { %848 = vmatpush1.msra.mxu0 %v404_v2  ;;  %v808_v55 = vsel %vm804_vm15, %v801_v58, %v803_v1  ;;  %v807_v34 = vsel %vm804_vm15, %v799_v4, %v801_v58 }
 0x1b3   : > { %849 = vmatprep.subr.mxu0 %v403_v47 }
 0x1b4   : > { %850 = vmatpush1.msra.mxu0 %v402_v53 }
 0x1b5   : > { %v795_v20 = vpop.permute.xlu1 %794  ;;  %v797_v5 = vpop.permute.xlu0 %796  ;;  %879 = vmatprep.subr.mxu0 %v808_v55 }
 0x1b6   : > { %880 = vmatpush2.msra.mxu0 %v807_v34  ;;  %v806_v8 = vsel %vm804_vm15, %v795_v20, %v797_v5 }
 0x1b7   : > { %881 = vmatprep.subr.mxu0 %v806_v8 }
 0x1b9   : > { %v793_v52 = vpop.permute.xlu1 %792 }
 0x1ba   : > { %v805_v11 = vsel %vm804_vm15, %v793_v52, %v795_v20 }
 0x1bb   : > { %882 = vmatpush2.msra.mxu0 %v805_v11 }
 0x1bc   : > { %884 = vmatmul.mubr.f32.vlgmr.msra.gmra.mxu0 %v362_v23 }
 0x1bd   : > { %2936 = vmatprep.mubr.msk.f32.mxu0 %vm467_vm4, %v365_v50 }
 0x1c0   : > { %890 = vmatmul.mubr.f32.gmra.mxu0 %v364_v44 }
 0x27c   : > { %v885_v9 = vpop.f32.mrf.mxu0 }
 0x27d   : > { %v896_v12 = vmax.f32 %v885_v9, 0.0  ;;  %v4975_v9 = vld [vmem:[#allocation17_spill] sm:$0xff] }
 0x27e   : > { %v887_v56 = vpop.f32.mrf.mxu0 }
 0x27f   : > { %v897_v39 = vmax.f32 %v887_v56, 0.0  ;;  %908 = vrot.lane.b32.xlu0 %v896_v12, %s3313_s30 }
 0x280   : > { %v891_v15 = vpop.f32.mrf.mxu0 }
 0x281   : > { %v898_v59 = vmax.f32 %v891_v15, 0.0  ;;  %910 = vrot.lane.b32.xlu1 %v897_v39, %s3313_s30 }
 0x282   : > { %v893_v46 = vpop.f32.mrf.mxu0 }
 0x283   : > { %v899_v14 = vmax.f32 %v893_v46, 0.0  ;;  %912 = vrot.lane.b32.xlu0 %v898_v59, %s3313_s30 }
 0x285   : > { %914 = vrot.lane.b32.xlu1 %v899_v14, %s3313_s30 }
 0x2f1   : > { %v909_v17 = vpop.permute.xlu0 %908 }
 0x2f2   : > { %v3927_v18 = vsel %vm378_vm0, 0.0, %v909_v17 }
 0x2f3   : > { %v911_v22 = vpop.permute.xlu1 %910  ;;  %v968_v21 = vmul.f32 %v3927_v18, %v3604_v36  ;;  %v962_v29 = vmul.f32 %v3927_v18, %v3631_v45  ;;  %v956_v28 = vmul.f32 %v3927_v18, %v3645_v51  ;;  %v950_v31 = vmul.f32 %v3927_v18, %v3661_v57 }
 0x2f4   : > { %v3932_v25 = vsel %vm378_vm0, %v911_v22, 0.0  ;;  %v944_v0 = vmul.f32 %v3927_v18, %v3677_v63  ;;  %v938_v4 = vmul.f32 %v3927_v18, %v3693_v7  ;;  %v932_v6 = vmul.f32 %v3927_v18, %v3709_v13 }
 0x2f5   : > { %1142 = vrot.lane.b32.xlu1 %v968_v21, %s3321_s13  ;;  %v970_v26 = vmul.f32 %v3932_v25, %v3619_v41  ;;  %v964_v61 = vmul.f32 %v3932_v25, %v3637_v48  ;;  %v958_v62 = vmul.f32 %v3932_v25, %v3653_v54  ;;  %v952_v32 = vmul.f32 %v3932_v25, %v3669_v60  ;;  %v913_v43 = vpop.permute.xlu0 %912 }
 0x2f6   : > { %v946_v35 = vmul.f32 %v3932_v25, %v3685_v3  ;;  %v940_v42 = vmul.f32 %v3932_v25, %v3701_v10  ;;  %v3971_v49 = vsel %vm378_vm0, %v909_v17, %v911_v22  ;;  %v934_v2 = vmul.f32 %v3932_v25, %v3717_v16 }
 0x2f7   : > { %1146 = vrot.lane.b32.xlu0 %v970_v26, %s3321_s13  ;;  %v3977_v1 = vsel %vm378_vm0, 0.0, %v913_v43  ;;  %v969_v58 = vmul.f32 %v3971_v49, %v3727_v19  ;;  %v963_v53 = vmul.f32 %v3971_v49, %v3747_v24  ;;  %v957_v20 = vmul.f32 %v3971_v49, %v3757_v27  ;;  %v915_v50 = vpop.permute.xlu1 %914 }
 0x2f8   : > { %v971_v47 = vmul.f32 %v3977_v1, %v3604_v36  ;;  %v965_v55 = vmul.f32 %v3977_v1, %v3631_v45  ;;  %v959_v5 = vmul.f32 %v3977_v1, %v3645_v51  ;;  %v951_v34 = vmul.f32 %v3971_v49, %v3768_v30 }
 0x2f9   : > { %1116 = vrot.lane.b32.xlu1 %v962_v29, %s3322_s15  ;;  %v953_v8 = vmul.f32 %v3977_v1, %v3661_v57  ;;  %v945_v52 = vmul.f32 %v3971_v49, %v3779_v33  ;;  %v947_v23 = vmul.f32 %v3977_v1, %v3677_v63  ;;  %v939_v11 = vmul.f32 %v3971_v49, %v3789_v40 }
 0x2fa   : > { %v941_v44 = vmul.f32 %v3977_v1, %v3693_v7  ;;  %v933_v12 = vmul.f32 %v3971_v49, %v4975_v9  ;;  %v927_v56 = vsel %vm378_vm0, %v915_v50, 0.0  ;;  %v935_v39 = vmul.f32 %v3977_v1, %v3709_v13 }
 0x2fb   : > { %1120 = vrot.lane.b32.xlu0 %v964_v61, %s3322_s15  ;;  %v4023_v15 = vsel %vm378_vm0, %v913_v43, %v915_v50  ;;  %v973_v59 = vmul.f32 %v927_v56, %v3619_v41  ;;  %v967_v14 = vmul.f32 %v927_v56, %v3637_v48  ;;  %v961_v22 = vmul.f32 %v927_v56, %v3653_v54  ;;  %v4977_v43 = vld [vmem:[#allocation18_spill] sm:$0xff] }
 0x2fc   : > { %v972_v46 = vmul.f32 %v4023_v15, %v3727_v19  ;;  %v966_v17 = vmul.f32 %v4023_v15, %v3747_v24  ;;  %v960_v21 = vmul.f32 %v4023_v15, %v3757_v27  ;;  %v955_v26 = vmul.f32 %v927_v56, %v3669_v60 }
 0x2fd   : > { %1090 = vrot.lane.b32.xlu1 %v956_v28, %s3323_s21  ;;  %v954_v29 = vmul.f32 %v4023_v15, %v3768_v30  ;;  %v949_v61 = vmul.f32 %v927_v56, %v3685_v3  ;;  %v948_v28 = vmul.f32 %v4023_v15, %v3779_v33 }
 0x2ff   : > { %1094 = vrot.lane.b32.xlu0 %v958_v62, %s3323_s21  ;;  %v943_v62 = vmul.f32 %v927_v56, %v3701_v10 }
 0x301   : > { %1064 = vrot.lane.b32.xlu1 %v950_v31, %s3324_s14  ;;  %v942_v31 = vmul.f32 %v4023_v15, %v3789_v40 }
 0x303   : > { %1068 = vrot.lane.b32.xlu0 %v952_v32, %s3324_s14  ;;  %v937_v32 = vmul.f32 %v927_v56, %v3717_v16 }
 0x305   : > { %1038 = vrot.lane.b32.xlu1 %v944_v0, %s3325_s12  ;;  %v936_v0 = vmul.f32 %v4023_v15, %v4975_v9 }
 0x307   : > { %1042 = vrot.lane.b32.xlu0 %v946_v35, %s3325_s12  ;;  %v4976_v35 = vld [vmem:[#allocation20_spill] sm:$0xff] }
 0x309   : > { %1012 = vrot.lane.b32.xlu1 %v938_v4, %s3326_s29  ;;  %v975_v4 = vmul.f32 %v3971_v49, %v4976_v35 }
 0x30b   : > { %1016 = vrot.lane.b32.xlu0 %v940_v42, %s3326_s29  ;;  %v901_v42 = vld [vmem:[#allocation7 + $0x8] sm:$0xff] }
 0x30c   : > { %2937 = vmatprep.mubr.msk.f32.mxu1 %vm467_vm4, %v901_v42 }
 0x30d   : > { %986 = vrot.lane.b32.xlu1 %v932_v6, %s3327_s18  ;;  %v977_v6 = vmul.f32 %v3977_v1, %v4977_v43 }
 0x30f   : > { %990 = vrot.lane.b32.xlu0 %v934_v2, %s3327_s18  ;;  %v4978_v2 = vld [vmem:[#allocation19_spill] sm:$0xff] }
 0x311   : > { %1144 = vrot.lane.b32.xlu1 %v969_v58, %s3321_s13  ;;  %v979_v58 = vmul.f32 %v927_v56, %v4978_v2 }
 0x313   : > { %1148 = vrot.lane.b32.xlu0 %v971_v47, %s3321_s13  ;;  %v978_v47 = vmul.f32 %v4023_v15, %v4976_v35 }
 0x315   : > { %1118 = vrot.lane.b32.xlu1 %v963_v53, %s3322_s15  ;;  %v974_v53 = vmul.f32 %v3927_v18, %v4977_v43 }
 0x317   : > { %1122 = vrot.lane.b32.xlu0 %v965_v55, %s3322_s15  ;;  %v976_v55 = vmul.f32 %v3932_v25, %v4978_v2 }
 0x319   : > { %1092 = vrot.lane.b32.xlu1 %v957_v20, %s3323_s21 }
 0x31b   : > { %1096 = vrot.lane.b32.xlu0 %v959_v5, %s3323_s21 }
 0x31d   : > { %1066 = vrot.lane.b32.xlu1 %v951_v34, %s3324_s14 }
 0x31f   : > { %1070 = vrot.lane.b32.xlu0 %v953_v8, %s3324_s14 }
 0x321   : > { %1040 = vrot.lane.b32.xlu1 %v945_v52, %s3325_s12 }
 0x323   : > { %1044 = vrot.lane.b32.xlu0 %v947_v23, %s3325_s12 }
 0x325   : > { %1014 = vrot.lane.b32.xlu1 %v939_v11, %s3326_s29 }
 0x327   : > { %1018 = vrot.lane.b32.xlu0 %v941_v44, %s3326_s29 }
 0x329   : > { %988 = vrot.lane.b32.xlu1 %v933_v12, %s3327_s18 }
 0x32b   : > { %992 = vrot.lane.b32.xlu0 %v935_v39, %s3327_s18 }
 0x32d   : > { %1152 = vrot.lane.b32.xlu1 %v973_v59, %s3321_s13 }
 0x32f   : > { %1150 = vrot.lane.b32.xlu0 %v972_v46, %s3321_s13 }
 0x331   : > { %1126 = vrot.lane.b32.xlu1 %v967_v14, %s3322_s15 }
 0x333   : > { %1124 = vrot.lane.b32.xlu0 %v966_v17, %s3322_s15 }
 0x335   : > { %1100 = vrot.lane.b32.xlu1 %v961_v22, %s3323_s21 }
 0x337   : > { %1098 = vrot.lane.b32.xlu0 %v960_v21, %s3323_s21 }
 0x339   : > { %1074 = vrot.lane.b32.xlu1 %v955_v26, %s3324_s14 }
 0x33b   : > { %1072 = vrot.lane.b32.xlu0 %v954_v29, %s3324_s14 }
 0x33d   : > { %1048 = vrot.lane.b32.xlu1 %v949_v61, %s3325_s12 }
 0x33f   : > { %1046 = vrot.lane.b32.xlu0 %v948_v28, %s3325_s12 }
 0x341   : > { %1022 = vrot.lane.b32.xlu1 %v943_v62, %s3326_s29 }
 0x343   : > { %1020 = vrot.lane.b32.xlu0 %v942_v31, %s3326_s29 }
 0x345   : > { %996 = vrot.lane.b32.xlu1 %v937_v32, %s3327_s18 }
 0x347   : > { %994 = vrot.lane.b32.xlu0 %v936_v0, %s3327_s18 }
 0x349   : > { %1170 = vrot.lane.b32.xlu1 %v975_v4, %s3328_s10 }
 0x34b   : > { %1174 = vrot.lane.b32.xlu0 %v977_v6, %s3328_s10 }
 0x34d   : > { %1178 = vrot.lane.b32.xlu1 %v979_v58, %s3328_s10 }
 0x34f   : > { %1176 = vrot.lane.b32.xlu0 %v978_v47, %s3328_s10 }
 0x351   : > { %1168 = vrot.lane.b32.xlu1 %v974_v53, %s3328_s10 }
 0x353   : > { %1172 = vrot.lane.b32.xlu0 %v976_v55, %s3328_s10 }
 0x367   : > { %v1143_v20 = vpop.permute.xlu1 %1142 }
 0x369   : > { %v1147_v5 = vpop.permute.xlu0 %1146 }
 0x36b   : > { %v1117_v34 = vpop.permute.xlu1 %1116 }
 0x36d   : > { %v1121_v8 = vpop.permute.xlu0 %1120 }
 0x36f   : > { %v1091_v52 = vpop.permute.xlu1 %1090 }
 0x371   : > { %v1095_v23 = vpop.permute.xlu0 %1094 }
 0x373   : > { %v4079_v11 = vpop.permute.xlu1 %1064 }
 0x375   : > { %v1069_v50 = vpop.permute.xlu0 %1068 }
 0x377   : > { %v4081_v44 = vpop.permute.xlu1 %1038 }
 0x379   : > { %v4083_v12 = vpop.permute.xlu0 %1042 }
 0x37b   : > { %v4085_v56 = vpop.permute.xlu1 %1012 }
 0x37d   : > { %v4087_v39 = vpop.permute.xlu0 %1016 }
 0x37f   : > { %v4089_v25 = vpop.permute.xlu1 %986 }
 0x381   : > { %v4091_v59 = vpop.permute.xlu0 %990 }
 0x383   : > { %v1145_v46 = vpop.permute.xlu1 %1144 }
 0x384   : > { %v1155_v55 = vsel %vm777_vm8, %v1145_v46, %v1147_v5  ;;  %v1154_v35 = vsel %vm777_vm8, %v1143_v20, %v1145_v46 }
 0x385   : > { %v1149_v14 = vpop.permute.xlu0 %1148 }
 0x387   : > { %v1119_v17 = vpop.permute.xlu1 %1118 }
 0x389   : > { %v1123_v22 = vpop.permute.xlu0 %1122 }
 0x38b   : > { %v1093_v21 = vpop.permute.xlu1 %1092 }
 0x38c   : > { %v1103_v20 = vsel %vm723_vm10, %v1093_v21, %v1095_v23 }
 0x38d   : > { %v1097_v26 = vpop.permute.xlu0 %1096 }
 0x38f   : > { %v1067_v29 = vpop.permute.xlu1 %1066 }
 0x391   : > { %v1071_v61 = vpop.permute.xlu0 %1070 }
 0x393   : > { %v1041_v28 = vpop.permute.xlu1 %1040 }
 0x395   : > { %v1045_v62 = vpop.permute.xlu0 %1044 }
 0x397   : > { %v4093_v31 = vpop.permute.xlu1 %1014 }
 0x399   : > { %v1019_v32 = vpop.permute.xlu0 %1018 }
 0x39b   : > { %v4095_v0 = vpop.permute.xlu1 %988 }
 0x39d   : > { %v4097_v4 = vpop.permute.xlu0 %992 }
 0x39f   : > { %v1153_v42 = vpop.permute.xlu1 %1152 }
 0x3a1   : > { %v1151_v6 = vpop.permute.xlu0 %1150 }
 0x3a2   : > { %v1157_v58 = vsel %vm777_vm8, %v1151_v6, %v1153_v42  ;;  %v1156_v47 = vsel %vm777_vm8, %v1149_v14, %v1151_v6  ;;  %v1129_v42 = vsel %vm750_vm9, %v1119_v17, %v1121_v8  ;;  %v1128_v6 = vsel %vm750_vm9, %v1117_v34, %v1119_v17 }
 0x3a3   : > { %1194 = vmatprep.subr.mxu1 %v1157_v58  ;;  %v1127_v53 = vpop.permute.xlu1 %1126  ;;  %v1076_v17 = vsel %vm696_vm11, %v4079_v11, %v1067_v29 }
 0x3a4   : > { %1195 = vmatpush1.msra.mxu1 %v1156_v47 }
 0x3a5   : > { %v1125_v43 = vpop.permute.xlu0 %1124  ;;  %1196 = vmatprep.subr.mxu1 %v1155_v55  ;;  %v998_v55 = vsel %vm615_vm14, %v4089_v25, %v4095_v0 }
 0x3a6   : > { %1197 = vmatpush1.msra.mxu1 %v1154_v35  ;;  %v1131_v13 = vsel %vm750_vm9, %v1125_v43, %v1127_v53  ;;  %v1130_v9 = vsel %vm750_vm9, %v1123_v22, %v1125_v43  ;;  %v999_v53 = vsel %vm615_vm14, %v4095_v0, %v4091_v59  ;;  %v928_v59 = vmul.f32 %v3927_v18, %v3901_v38  ;;  %v902_v18 = vld [vmem:[#allocation7 + $0x10] sm:$0xff] }
 0x3a7   : > { %1198 = vmatprep.subr.mxu1 %v1131_v13  ;;  %v1101_v7 = vpop.permute.xlu1 %1100  ;;  %v1102_v13 = vsel %vm723_vm10, %v1091_v52, %v1093_v21  ;;  %v1051_v21 = vsel %vm669_vm12, %v1041_v28, %v4083_v12  ;;  %v1024_v12 = vsel %vm642_vm13, %v4085_v56, %v4093_v31  ;;  %v931_v56 = vmul.f32 %v4023_v15, %v3896_v37 }
 0x3a8   : > { %1199 = vmatpush1.msra.mxu1 %v1130_v9 }
 0x3a9   : > { %v1099_v14 = vpop.permute.xlu0 %1098  ;;  %1200 = vmatprep.subr.mxu1 %v1129_v42  ;;  %v929_v42 = vmul.f32 %v3971_v49, %v3896_v37 }
 0x3aa   : > { %1201 = vmatpush1.msra.mxu1 %v1128_v6  ;;  %v1105_v5 = vsel %vm723_vm10, %v1099_v14, %v1101_v7  ;;  %v1104_v58 = vsel %vm723_vm10, %v1097_v26, %v1099_v14  ;;  %v1077_v7 = vsel %vm696_vm11, %v1067_v29, %v1069_v50  ;;  %v1050_v50 = vsel %vm669_vm12, %v4081_v44, %v1041_v28 }
 0x3ab   : > { %1202 = vmatprep.subr.mxu1 %v1105_v5  ;;  %v1075_v35 = vpop.permute.xlu1 %1074  ;;  %v900_v5 = vld [vmem:[#allocation7] sm:$0xff] }
 0x3ac   : > { %1203 = vmatpush1.msra.mxu1 %v1104_v58  ;;  %v903_v58 = vld [vmem:[#allocation7 + $0x18] sm:$0xff] }
 0x3ad   : > { %v1073_v43 = vpop.permute.xlu0 %1072  ;;  %1204 = vmatprep.subr.mxu1 %v1103_v20 }
 0x3ae   : > { %1205 = vmatpush1.msra.mxu1 %v1102_v13  ;;  %v1079_v9 = vsel %vm696_vm11, %v1073_v43, %v1075_v35  ;;  %v1078_v8 = vsel %vm696_vm11, %v1071_v61, %v1073_v43 }
 0x3af   : > { %1206 = vmatprep.subr.mxu1 %v1079_v9  ;;  %v1049_v34 = vpop.permute.xlu1 %1048 }
 0x3b0   : > { %1207 = vmatpush1.msra.mxu1 %v1078_v8 }
 0x3b1   : > { %v1047_v46 = vpop.permute.xlu0 %1046  ;;  %1208 = vmatprep.subr.mxu1 %v1077_v7 }
 0x3b2   : > { %1209 = vmatpush1.msra.mxu1 %v1076_v17  ;;  %v1053_v23 = vsel %vm669_vm12, %v1047_v46, %v1049_v34  ;;  %v1052_v52 = vsel %vm669_vm12, %v1045_v62, %v1047_v46  ;;  %v1025_v62 = vsel %vm642_vm13, %v4093_v31, %v4087_v39  ;;  %v930_v31 = vmul.f32 %v3977_v1, %v3901_v38 }
 0x3b3   : > { %1210 = vmatprep.subr.mxu1 %v1053_v23  ;;  %v1023_v22 = vpop.permute.xlu1 %1022  ;;  %v4942_v34 = vmov 0.0  }
 0x3b4   : > { %1211 = vmatpush1.msra.mxu1 %v1052_v52  ;;  %v1279_v52 = vld [vmem:[#allocation8] sm:$0xf] }
 0x3b5   : > { %v1021_v26 = vpop.permute.xlu0 %1020  ;;  %1212 = vmatprep.subr.mxu1 %v1051_v21 }
 0x3b6   : > { %1213 = vmatpush1.msra.mxu1 %v1050_v50  ;;  %v1027_v61 = vsel %vm642_vm13, %v1021_v26, %v1023_v22  ;;  %v1026_v11 = vsel %vm642_vm13, %v1019_v32, %v1021_v26  ;;  %v1354_v22 = vld [vmem:[%s4916_s5] sm:$0xff] }
 0x3b7   : > { %1214 = vmatprep.subr.mxu1 %v1027_v61  ;;  %v997_v29 = vpop.permute.xlu1 %996  ;;  %v1355_v61 = vld [vmem:[%s4916_s5 + $0x8] sm:$0xff] }
 0x3b8   : > { %1215 = vmatpush1.msra.mxu1 %v1026_v11  ;;  %v3331_v11 = vmov 0  }
 0x3b9   : > { %v995_v47 = vpop.permute.xlu0 %994  ;;  %1216 = vmatprep.subr.mxu1 %v1025_v62  ;;  %3099 = vset.pattern.permute.xlu0 %v3331_v11 }
 0x3ba   : > { %1217 = vmatpush1.msra.mxu1 %v1024_v12  ;;  %v1001_v44 = vsel %vm615_vm14, %v995_v47, %v997_v29  ;;  %v1000_v28 = vsel %vm615_vm14, %v4097_v4, %v995_v47  ;;  %3100 = vset.pattern.permute.xlu1 %v3331_v11 }
 0x3bb   : > { %1218 = vmatprep.subr.mxu1 %v1001_v44  ;;  %v1171_v32 = vpop.permute.xlu1 %1170 }
 0x3bc   : > { %1219 = vmatpush1.msra.mxu1 %v1000_v28 }
 0x3bd   : > { %v1175_v39 = vpop.permute.xlu0 %1174  ;;  %1220 = vmatprep.subr.mxu1 %v999_v53 }
 0x3be   : > { %1221 = vmatpush1.msra.mxu1 %v998_v55 }
 0x3bf   : > { %1222 = vmatprep.subr.mxu1 %v931_v56  ;;  %v1179_v4 = vpop.permute.xlu1 %1178 }
 0x3c0   : > { %1223 = vmatpush1.msra.mxu1 %v930_v31 }
 0x3c1   : > { %v1177_v14 = vpop.permute.xlu0 %1176  ;;  %1224 = vmatprep.subr.mxu1 %v929_v42 }
 0x3c2   : > { %1225 = vmatpush1.msra.mxu1 %v928_v59  ;;  %v1183_v25 = vsel %vm804_vm15, %v1177_v14, %v1179_v4  ;;  %v1182_v15 = vsel %vm804_vm15, %v1175_v39, %v1177_v14  ;;  %v3117_v14 = vld [vmem:[%s3524_s20 + $0x10] sm:$0xff] }
 0x3c3   : > { %1254 = vmatprep.subr.mxu1 %v1183_v25  ;;  %v1169_v0 = vpop.permute.xlu1 %1168 }
 0x3c4   : > { %1255 = vmatpush2.msra.mxu1 %v1182_v15  ;;  %v1180_v49 = vsel %vm804_vm15, %v1169_v0, %v1171_v32  ;;  %v3118_v0 = vld [vmem:[%s3524_s20 + $0x18] sm:$0xff] }
 0x3c5   : > { %v1173_v1 = vpop.permute.xlu0 %1172 }
 0x3c6   : > { %v1181_v6 = vsel %vm804_vm15, %v1171_v32, %v1173_v1 }
 0x3c7   : > { %1256 = vmatprep.subr.mxu1 %v1181_v6 }
 0x3c8   : > { %1257 = vmatpush2.msra.mxu1 %v1180_v49  ;;  %v3119_v49 = vld [vmem:[%s3524_s20] sm:$0xff] }
 0x3c9   : > { %1259 = vmatmul.mubr.f32.vlgmr.msra.gmra.mxu1 %v900_v5  ;;  %2974 = vmatprep.subr.mxu1 %v4942_v34 }
 0x3ca   : > { %2938 = vmatprep.mubr.msk.f32.mxu1 %vm467_vm4, %v903_v58 }
 0x3cd   : > { %1265 = vmatmul.mubr.f32.gmra.mxu1 %v902_v18  ;;  %v3120_v18 = vld [vmem:[%s3524_s20 + $0x8] sm:$0xff] }
 0x3ce   : > { %2978 = vmatprep.mubr.msk.f32.mxu1 %vm3330_vm1, %v4942_v34 }
 0x489   : > { %v1260_v35 = vpop.f32.mrf.mxu1 }
 0x48b   : > { %v4152_v20 = vpop.f32.mrf.mxu1 }
 0x48c   : > { %v1271_v43 = vadd.f32 %v4152_v20, %v1260_v35 }
 0x48d   : > { %v1266_v13 = vpop.f32.mrf.mxu1 }
 0x48e   : > { %1272 = vadd.xlane.f32.xlu1 %v1271_v43 }
 0x48f   : > { %v1268_v9 = vpop.f32.mrf.mxu1 }
 0x490   : > { %v1274_v8 = vadd.f32 %v1268_v9, %v1266_v13 }
 0x492   : > { %1275 = vadd.xlane.f32.xlu0 %v1274_v8 }
 0x517   : > { %v1273_v7 = vpop.xlane.xlu1 %1272 }
 0x518   : > { %v1277_v23 = vmul.f32 0.00390625, %v1273_v7 }
 0x51b   : > { %v1276_v46 = vpop.xlane.xlu0 %1275 }
 0x51c   : > { %v1278_v17 = vmul.f32 0.00390625, %v1276_v46 }
 0x51e   : > { %2975 = vmatpush3.msra.mxu1 %v1278_v17 }
 0x51f   : > { %2976 = vmatprep.subr.mxu1 %v4942_v34 }
 0x520   : > { %2977 = vmatpush3.msra.mxu1 %v1277_v23 }
 0x521   : > { %2979 = vmatmul.mubr.msk.f32.vlgmr.msra.gmra.mxu1 %vm467_vm4, %v1279_v52 }
 0x522   : > { %2983 = vmatprep.mubr.msk.f32.mxu1 %vm1356_vm2, %v1354_v22 }
 0x5e1   : > { %v1349_v21 = vpop.f32.mrf.mxu1 }
 0x5e2   : > { %v1353_v26 = vmax.f32 %v1349_v21, 0.0 }
 0x5e3   : > { %v2980_v50 = vpop.f32.mrf.mxu1 }
 0x5e4   : > { %2981 = vmatprep.subr.msk.mxu1 %vm1363_vm3, %v1353_v26 }
 0x5e5   : > { %2982 = vmatpush3.msk.msra.mxu1 %vm1363_vm3, %v1353_v26 }
 0x5e6   : > { %2984 = vmatmul.mubr.msk.f32.vlgmr.msra.gmra.mxu1 %vm1356_vm2, %v1355_v61 }
 0x6a6   : > { %v2985_v29 = vpop.f32.mrf.mxu1 }
 0x6a7   : > { %v1443_v62 = vsub.f32 0.0, %v2985_v29 }
 0x6a8   : > { %v1433_v47 = vpop.f32.mrf.mxu1 }
 0x6a9   : > { %v1446_v12 = vmul.f32 1.442695, %v1443_v62  ;;  %v1442_v44 = vsub.f32 0.0, %v1433_v47 }
 0x6ab   : > { %3101 = vpow2.f32 %v1446_v12  ;;  %v1444_v28 = vmul.f32 1.442695, %v1442_v44 }
 0x6ad   : > { %3103 = vpow2.f32 %v1444_v28 }
 0x6b8   : > { %v3102_v32 = vpop.eup %3101 }
 0x6b9   : > { %v1449_v53 = vadd.f32 1.0, %v3102_v32 }
 0x6ba   : > { %v3104_v39 = vpop.eup %3103 }
 0x6bb   : > { %3105 = vrcp.f32 %v1449_v53  ;;  %v1448_v55 = vadd.f32 1.0, %v3104_v39 }
 0x6bd   : > { %3107 = vrcp.f32 %v1448_v55 }
 0x6c8   : > { %v3106_v56 = vpop.eup %3105 }
 0x6c9   : > { %1461 = vperm.xlu0 %3099, %v3106_v56  }
 0x6ca   : > { %v3108_v31 = vpop.eup %3107 }
 0x6cb   : > { %1456 = vperm.xlu1 %3100, %v3108_v31   ;;  %v4983_v31 = vld [vmem:[#allocation15_spill] sm:$0xff] }
 0x744   : > { %v1462_v4 = vpop.permute.xlu0 %1461 }
 0x745   : > { %v1466_v42 = vmul.f32 %v1462_v4, %v1266_v13  ;;  %v1467_v59 = vmul.f32 %v1462_v4, %v1268_v9 }
 0x746   : > { %v1457_v15 = vpop.permute.xlu1 %1456 }
 0x747   : > { %v4171_v25 = vadd.f32 %v3117_v14, %v1466_v42  ;;  %v4176_v1 = vadd.f32 %v3118_v0, %v1467_v59  ;;  %v1464_v6 = vmul.f32 %v1457_v15, %v1260_v35  ;;  %v1465_v5 = vmul.f32 %v1457_v15, %v4152_v20  ;;  %v4984_v14 = vld [vmem:[#allocation17_spill] sm:$0xff] }
 0x749   : > { %4979 = vst [vmem:[#allocation19_spill] sm:$0xff] %v4171_v25  ;;  %1485 = vrot.lane.b32.xlu1 %v4171_v25, %s3313_s30  ;;  %4980 = vst [vmem:[#allocation21_spill] sm:$0xff] %v4176_v1  ;;  %v4182_v58 = vadd.f32 %v3119_v49, %v1464_v6  ;;  %v4187_v43 = vadd.f32 %v3120_v18, %v1465_v5  ;;  %v4985_v6 = vld [vmem:[#allocation16_spill] sm:$0xff] }
 0x74a   : > { %v4986_v18 = vld [vmem:[#allocation20_spill] sm:$0xff] }
 0x74b   : > { %4981 = vst [vmem:[#allocation22_spill] sm:$0xff] %v4182_v58  ;;  %4982 = vst [vmem:[#allocation23_spill] sm:$0xff] %v4187_v43 }
 0x74d   : > { %1487 = vrot.lane.b32.xlu1 %v4176_v1, %s3313_s30 }
 0x751   : > { %1481 = vrot.lane.b32.xlu1 %v4182_v58, %s3313_s30 }
 0x755   : > { %1483 = vrot.lane.b32.xlu1 %v4187_v43, %s3313_s30 }
 0x7bb   : > { %v1486_v13 = vpop.permute.xlu1 %1485 }
 0x7bc   : > { %v4192_v35 = vsel %vm378_vm0, 0.0, %v1486_v13 }
 0x7bd   : > { %v1544_v9 = vmul.f32 %v4192_v35, %v3604_v36  ;;  %v1538_v52 = vmul.f32 %v4192_v35, %v3631_v45  ;;  %v1532_v50 = vmul.f32 %v4192_v35, %v3645_v51  ;;  %v1526_v62 = vmul.f32 %v4192_v35, %v3661_v57 }
 0x7be   : > { %v1520_v32 = vmul.f32 %v4192_v35, %v3677_v63  ;;  %v1514_v4 = vmul.f32 %v4192_v35, %v4983_v31  ;;  %v1508_v5 = vmul.f32 %v4192_v35, %v4985_v6 }
 0x7bf   : > { %1721 = vrot.lane.b32.xlu0 %v1544_v9, %s3321_s13  ;;  %v1488_v20 = vpop.permute.xlu1 %1487 }
 0x7c0   : > { %v4198_v8 = vsel %vm378_vm0, %v1486_v13, %v1488_v20  ;;  %v1500_v17 = vsel %vm378_vm0, %v1488_v20, 0.0 }
 0x7c1   : > { %v1545_v7 = vmul.f32 %v4198_v8, %v3727_v19  ;;  %v1539_v46 = vmul.f32 %v4198_v8, %v3747_v24  ;;  %v1546_v23 = vmul.f32 %v1500_v17, %v3619_v41  ;;  %v1540_v22 = vmul.f32 %v1500_v17, %v3637_v48 }
 0x7c2   : > { %v1533_v21 = vmul.f32 %v4198_v8, %v3757_v27  ;;  %v1534_v26 = vmul.f32 %v1500_v17, %v3653_v54  ;;  %v1528_v61 = vmul.f32 %v1500_v17, %v3669_v60  ;;  %v1527_v11 = vmul.f32 %v4198_v8, %v3768_v30 }
 0x7c3   : > { %1723 = vrot.lane.b32.xlu1 %v1545_v7, %s3321_s13  ;;  %1697 = vrot.lane.b32.xlu0 %v1539_v46, %s3322_s15  ;;  %v1522_v29 = vmul.f32 %v1500_v17, %v3685_v3  ;;  %v1482_v47 = vpop.permute.xlu1 %1481  ;;  %v1516_v12 = vmul.f32 %v1500_v17, %v3701_v10  ;;  %v1521_v44 = vmul.f32 %v4198_v8, %v3779_v33 }
 0x7c4   : > { %v1510_v28 = vmul.f32 %v1500_v17, %v3717_v16  ;;  %v1552_v39 = vmul.f32 %v1500_v17, %v4978_v2  ;;  %v1515_v55 = vmul.f32 %v4198_v8, %v3789_v40  ;;  %v4255_v59 = vsel %vm378_vm0, 0.0, %v1482_v47 }
 0x7c5   : > { %v1509_v15 = vmul.f32 %v4198_v8, %v4984_v14  ;;  %v1541_v0 = vmul.f32 %v4255_v59, %v3604_v36  ;;  %v1551_v13 = vmul.f32 %v4198_v8, %v4986_v18  ;;  %v1535_v9 = vmul.f32 %v4255_v59, %v3631_v45 }
 0x7c7   : > { %1725 = vrot.lane.b32.xlu1 %v1546_v23, %s3321_s13  ;;  %1695 = vrot.lane.b32.xlu0 %v1538_v52, %s3322_s15  ;;  %v1484_v53 = vpop.permute.xlu1 %1483  ;;  %v1529_v23 = vmul.f32 %v4255_v59, %v3645_v51 }
 0x7c8   : > { %v4246_v56 = vsel %vm378_vm0, %v1482_v47, %v1484_v53  ;;  %v1499_v20 = vsel %vm378_vm0, %v1484_v53, 0.0 }
 0x7c9   : > { %v1542_v42 = vmul.f32 %v4246_v56, %v3727_v19  ;;  %v1536_v49 = vmul.f32 %v4246_v56, %v3747_v24  ;;  %v1543_v7 = vmul.f32 %v1499_v20, %v3619_v41  ;;  %v1530_v46 = vmul.f32 %v4246_v56, %v3757_v27 }
 0x7ca   : > { %v1537_v17 = vmul.f32 %v1499_v20, %v3637_v48  ;;  %v1531_v52 = vmul.f32 %v1499_v20, %v3653_v54  ;;  %v1512_v47 = vmul.f32 %v4246_v56, %v3789_v40  ;;  %v1506_v53 = vmul.f32 %v4246_v56, %v4984_v14 }
 0x7cb   : > { %1699 = vrot.lane.b32.xlu1 %v1540_v22, %s3322_s15  ;;  %1671 = vrot.lane.b32.xlu0 %v1533_v21, %s3323_s21  ;;  %v1524_v22 = vmul.f32 %v4246_v56, %v3768_v30  ;;  %v1525_v21 = vmul.f32 %v1499_v20, %v3669_v60 }
 0x7cf   : > { %1673 = vrot.lane.b32.xlu1 %v1534_v26, %s3323_s21  ;;  %1669 = vrot.lane.b32.xlu0 %v1532_v50, %s3323_s21  ;;  %v1523_v26 = vmul.f32 %v4255_v59, %v3661_v57  ;;  %v1519_v50 = vmul.f32 %v1499_v20, %v3685_v3 }
 0x7d3   : > { %1647 = vrot.lane.b32.xlu1 %v1528_v61, %s3324_s14  ;;  %1645 = vrot.lane.b32.xlu0 %v1527_v11, %s3324_s14  ;;  %v1518_v61 = vmul.f32 %v4246_v56, %v3779_v33  ;;  %v1513_v11 = vmul.f32 %v1499_v20, %v3701_v10 }
 0x7d7   : > { %1621 = vrot.lane.b32.xlu1 %v1522_v29, %s3325_s12  ;;  %1643 = vrot.lane.b32.xlu0 %v1526_v62, %s3324_s14  ;;  %v1517_v29 = vmul.f32 %v4255_v59, %v3677_v63  ;;  %v1507_v62 = vmul.f32 %v1499_v20, %v3717_v16 }
 0x7db   : > { %1595 = vrot.lane.b32.xlu1 %v1516_v12, %s3326_s29  ;;  %1619 = vrot.lane.b32.xlu0 %v1521_v44, %s3325_s12  ;;  %v4987_v12 = vld [vmem:[#allocation18_spill] sm:$0xff] }
 0x7dc   : > { %v1550_v44 = vmul.f32 %v4192_v35, %v4987_v12 }
 0x7df   : > { %1569 = vrot.lane.b32.xlu1 %v1510_v28, %s3327_s18  ;;  %1617 = vrot.lane.b32.xlu0 %v1520_v32, %s3325_s12  ;;  %v1511_v28 = vmul.f32 %v4255_v59, %v4983_v31  ;;  %v1549_v32 = vmul.f32 %v1499_v20, %v4978_v2 }
 0x7e3   : > { %1751 = vrot.lane.b32.xlu1 %v1552_v39, %s3328_s10  ;;  %1593 = vrot.lane.b32.xlu0 %v1515_v55, %s3326_s29  ;;  %v1474_v39 = vld [vmem:[#allocation5 + $0x28] sm:$0xff]  ;;  %v1505_v55 = vmul.f32 %v4255_v59, %v4985_v6 }
 0x7e4   : > { %2943 = vmatprep.mubr.msk.f32.mxu0 %vm467_vm4, %v1474_v39 }
 0x7e7   : > { %1591 = vrot.lane.b32.xlu0 %v1514_v4, %s3326_s29  ;;  %1717 = vrot.lane.b32.xlu1 %v1542_v42, %s3321_s13  ;;  %v1548_v4 = vmul.f32 %v4246_v56, %v4986_v18  ;;  %v1547_v42 = vmul.f32 %v4255_v59, %v4987_v12 }
 0x7eb   : > { %1567 = vrot.lane.b32.xlu0 %v1509_v15, %s3327_s18  ;;  %1715 = vrot.lane.b32.xlu1 %v1541_v0, %s3321_s13 }
 0x7ef   : > { %1565 = vrot.lane.b32.xlu0 %v1508_v5, %s3327_s18  ;;  %1691 = vrot.lane.b32.xlu1 %v1536_v49, %s3322_s15 }
 0x7f3   : > { %1749 = vrot.lane.b32.xlu0 %v1551_v13, %s3328_s10  ;;  %1689 = vrot.lane.b32.xlu1 %v1535_v9, %s3322_s15 }
 0x7f7   : > { %1719 = vrot.lane.b32.xlu0 %v1543_v7, %s3321_s13  ;;  %1665 = vrot.lane.b32.xlu1 %v1530_v46, %s3323_s21 }
 0x7fb   : > { %1693 = vrot.lane.b32.xlu0 %v1537_v17, %s3322_s15  ;;  %1663 = vrot.lane.b32.xlu1 %v1529_v23, %s3323_s21 }
 0x7ff   : > { %1667 = vrot.lane.b32.xlu0 %v1531_v52, %s3323_s21  ;;  %1639 = vrot.lane.b32.xlu1 %v1524_v22, %s3324_s14 }
 0x803   : > { %1641 = vrot.lane.b32.xlu0 %v1525_v21, %s3324_s14  ;;  %1637 = vrot.lane.b32.xlu1 %v1523_v26, %s3324_s14 }
 0x807   : > { %1615 = vrot.lane.b32.xlu0 %v1519_v50, %s3325_s12  ;;  %1613 = vrot.lane.b32.xlu1 %v1518_v61, %s3325_s12 }
 0x80b   : > { %1589 = vrot.lane.b32.xlu0 %v1513_v11, %s3326_s29  ;;  %1611 = vrot.lane.b32.xlu1 %v1517_v29, %s3325_s12 }
 0x80f   : > { %1563 = vrot.lane.b32.xlu0 %v1507_v62, %s3327_s18  ;;  %1587 = vrot.lane.b32.xlu1 %v1512_v47, %s3326_s29 }
 0x813   : > { %1747 = vrot.lane.b32.xlu0 %v1550_v44, %s3328_s10  ;;  %1585 = vrot.lane.b32.xlu1 %v1511_v28, %s3326_s29 }
 0x817   : > { %1745 = vrot.lane.b32.xlu0 %v1549_v32, %s3328_s10  ;;  %1561 = vrot.lane.b32.xlu1 %v1506_v53, %s3327_s18 }
 0x81b   : > { %1559 = vrot.lane.b32.xlu1 %v1505_v55, %s3327_s18 }
 0x81f   : > { %1743 = vrot.lane.b32.xlu1 %v1548_v4, %s3328_s10 }
 0x823   : > { %1741 = vrot.lane.b32.xlu1 %v1547_v42, %s3328_s10 }
 0x831   : > { %v1722_v15 = vpop.permute.xlu0 %1721 }
 0x835   : > { %v1698_v0 = vpop.permute.xlu0 %1697  ;;  %v1724_v5 = vpop.permute.xlu1 %1723 }
 0x836   : > { %v1729_v20 = vsel %vm777_vm8, %v1722_v15, %v1724_v5 }
 0x839   : > { %v1696_v49 = vpop.permute.xlu0 %1695  ;;  %v1726_v13 = vpop.permute.xlu1 %1725 }
 0x83a   : > { %v1730_v9 = vsel %vm777_vm8, %v1724_v5, %v1726_v13  ;;  %v1703_v34 = vsel %vm750_vm9, %v1696_v49, %v1698_v0 }
 0x83b   : > { %1767 = vmatprep.subr.mxu0 %v1730_v9 }
 0x83c   : > { %1768 = vmatpush1.msra.mxu0 %v1729_v20 }
 0x83d   : > { %v1672_v7 = vpop.permute.xlu0 %1671  ;;  %v1700_v46 = vpop.permute.xlu1 %1699 }
 0x83e   : > { %v1704_v20 = vsel %vm750_vm9, %v1698_v0, %v1700_v46 }
 0x841   : > { %v1670_v17 = vpop.permute.xlu0 %1669  ;;  %v1674_v23 = vpop.permute.xlu1 %1673 }
 0x845   : > { %v1646_v52 = vpop.permute.xlu0 %1645  ;;  %v1648_v22 = vpop.permute.xlu1 %1647 }
 0x849   : > { %v1644_v21 = vpop.permute.xlu0 %1643  ;;  %v1622_v26 = vpop.permute.xlu1 %1621 }
 0x84d   : > { %v1620_v50 = vpop.permute.xlu0 %1619  ;;  %v1596_v61 = vpop.permute.xlu1 %1595 }
 0x851   : > { %v1618_v11 = vpop.permute.xlu0 %1617  ;;  %v4336_v29 = vpop.permute.xlu1 %1569 }
 0x855   : > { %v1594_v62 = vpop.permute.xlu0 %1593  ;;  %v4338_v47 = vpop.permute.xlu1 %1751 }
 0x859   : > { %v1592_v44 = vpop.permute.xlu0 %1591  ;;  %v1718_v28 = vpop.permute.xlu1 %1717 }
 0x85d   : > { %v4340_v32 = vpop.permute.xlu0 %1567  ;;  %v1716_v53 = vpop.permute.xlu1 %1715 }
 0x85e   : > { %v1727_v9 = vsel %vm777_vm8, %v1716_v53, %v1718_v28 }
 0x861   : > { %v4342_v39 = vpop.permute.xlu0 %1565  ;;  %v1692_v55 = vpop.permute.xlu1 %1691 }
 0x865   : > { %v4344_v4 = vpop.permute.xlu0 %1749  ;;  %v1690_v42 = vpop.permute.xlu1 %1689 }
 0x866   : > { %v1701_v25 = vsel %vm750_vm9, %v1690_v42, %v1692_v55  ;;  %v1600_v42 = vsel %vm642_vm13, %v1594_v62, %v1596_v61  ;;  %v1573_v61 = vsel %vm615_vm14, %v4342_v39, %v4340_v32 }
 0x869   : > { %v1720_v15 = vpop.permute.xlu0 %1719  ;;  %v1666_v5 = vpop.permute.xlu1 %1665 }
 0x86a   : > { %v1728_v13 = vsel %vm777_vm8, %v1718_v28, %v1720_v15  ;;  %v1678_v15 = vsel %vm723_vm10, %v1672_v7, %v1674_v23  ;;  %v1677_v28 = vsel %vm723_vm10, %v1670_v17, %v1672_v7  ;;  %v1626_v17 = vsel %vm669_vm12, %v1620_v50, %v1622_v26 }
 0x86b   : > { %1769 = vmatprep.subr.mxu0 %v1728_v13 }
 0x86c   : > { %1770 = vmatpush1.msra.mxu0 %v1727_v9 }
 0x86d   : > { %v1694_v43 = vpop.permute.xlu0 %1693  ;;  %1771 = vmatprep.subr.mxu0 %v1704_v20  ;;  %v1664_v58 = vpop.permute.xlu1 %1663 }
 0x86e   : > { %1772 = vmatpush1.msra.mxu0 %v1703_v34  ;;  %v1702_v1 = vsel %vm750_vm9, %v1692_v55, %v1694_v43  ;;  %v1675_v49 = vsel %vm723_vm10, %v1664_v58, %v1666_v5  ;;  %v1652_v34 = vsel %vm696_vm11, %v1646_v52, %v1648_v22  ;;  %v1651_v43 = vsel %vm696_vm11, %v1644_v21, %v1646_v52 }
 0x86f   : > { %1773 = vmatprep.subr.mxu0 %v1702_v1  ;;  %v1625_v58 = vsel %vm669_vm12, %v1618_v11, %v1620_v50 }
 0x870   : > { %1774 = vmatpush1.msra.mxu0 %v1701_v25 }
 0x871   : > { %v1668_v53 = vpop.permute.xlu0 %1667  ;;  %1775 = vmatprep.subr.mxu0 %v1678_v15  ;;  %v1640_v13 = vpop.permute.xlu1 %1639  ;;  %v1574_v15 = vsel %vm615_vm14, %v4340_v32, %v4336_v29  ;;  %v1503_v29 = vmul.f32 %v4192_v35, %v3901_v38  ;;  %v1502_v32 = vmul.f32 %v4246_v56, %v3896_v37 }
 0x872   : > { %1776 = vmatpush1.msra.mxu0 %v1677_v28  ;;  %v1676_v0 = vsel %vm723_vm10, %v1666_v5, %v1668_v53  ;;  %v1599_v5 = vsel %vm642_vm13, %v1592_v44, %v1594_v62 }
 0x873   : > { %1777 = vmatprep.subr.mxu0 %v1676_v0 }
 0x874   : > { %1778 = vmatpush1.msra.mxu0 %v1675_v49  ;;  %v1504_v49 = vmul.f32 %v4198_v8, %v3896_v37 }
 0x875   : > { %v1642_v1 = vpop.permute.xlu0 %1641  ;;  %1779 = vmatprep.subr.mxu0 %v1652_v34  ;;  %v1638_v25 = vpop.permute.xlu1 %1637  ;;  %v1501_v34 = vmul.f32 %v4255_v59, %v3901_v38  ;;  %v1476_v59 = vld [vmem:[#allocation5 + $0x38] sm:$0xff] }
 0x876   : > { %v1649_v46 = vsel %vm696_vm11, %v1638_v25, %v1640_v13  ;;  %1780 = vmatpush1.msra.mxu0 %v1651_v43  ;;  %v1650_v7 = vsel %vm696_vm11, %v1640_v13, %v1642_v1  ;;  %v1756_v43 = vsel %vm804_vm15, %v4344_v4, %v4338_v47  ;;  %v1473_v25 = vld [vmem:[#allocation5 + $0x20] sm:$0xff] }
 0x877   : > { %1781 = vmatprep.subr.mxu0 %v1650_v7  ;;  %v1475_v7 = vld [vmem:[#allocation5 + $0x30] sm:$0xff] }
 0x878   : > { %1782 = vmatpush1.msra.mxu0 %v1649_v46 }
 0x879   : > { %v1616_v23 = vpop.permute.xlu0 %1615  ;;  %1783 = vmatprep.subr.mxu0 %v1626_v17  ;;  %v1614_v55 = vpop.permute.xlu1 %1613 }
 0x87a   : > { %1784 = vmatpush1.msra.mxu0 %v1625_v58  ;;  %v1624_v52 = vsel %vm669_vm12, %v1614_v55, %v1616_v23 }
 0x87b   : > { %1785 = vmatprep.subr.mxu0 %v1624_v52 }
 0x87d   : > { %v1612_v22 = vpop.permute.xlu1 %1611  ;;  %v1590_v9 = vpop.permute.xlu0 %1589 }
 0x87e   : > { %v1623_v21 = vsel %vm669_vm12, %v1612_v22, %v1614_v55 }
 0x87f   : > { %1786 = vmatpush1.msra.mxu0 %v1623_v21 }
 0x880   : > { %1787 = vmatprep.subr.mxu0 %v1600_v42 }
 0x881   : > { %1788 = vmatpush1.msra.mxu0 %v1599_v5  ;;  %v1588_v26 = vpop.permute.xlu1 %1587  ;;  %v1564_v62 = vpop.permute.xlu0 %1563 }
 0x882   : > { %v1598_v50 = vsel %vm642_vm13, %v1588_v26, %v1590_v9 }
 0x883   : > { %1789 = vmatprep.subr.mxu0 %v1598_v50 }
 0x885   : > { %v1586_v11 = vpop.permute.xlu1 %1585  ;;  %v1748_v13 = vpop.permute.xlu0 %1747 }
 0x886   : > { %v1597_v20 = vsel %vm642_vm13, %v1586_v11, %v1588_v26  ;;  %v1755_v8 = vsel %vm804_vm15, %v1748_v13, %v4344_v4 }
 0x887   : > { %1790 = vmatpush1.msra.mxu0 %v1597_v20 }
 0x888   : > { %1791 = vmatprep.subr.mxu0 %v1574_v15 }
 0x889   : > { %1792 = vmatpush1.msra.mxu0 %v1573_v61  ;;  %v1562_v44 = vpop.permute.xlu1 %1561  ;;  %v1746_v1 = vpop.permute.xlu0 %1745 }
 0x88a   : > { %v1572_v28 = vsel %vm615_vm14, %v1562_v44, %v1564_v62 }
 0x88b   : > { %1793 = vmatprep.subr.mxu0 %v1572_v28 }
 0x88d   : > { %v1560_v53 = vpop.permute.xlu1 %1559 }
 0x88e   : > { %v1571_v0 = vsel %vm615_vm14, %v1560_v53, %v1562_v44 }
 0x88f   : > { %1794 = vmatpush1.msra.mxu0 %v1571_v0 }
 0x890   : > { %1795 = vmatprep.subr.mxu0 %v1504_v49 }
 0x891   : > { %1796 = vmatpush1.msra.mxu0 %v1503_v29  ;;  %v1744_v39 = vpop.permute.xlu1 %1743 }
 0x892   : > { %1797 = vmatprep.subr.mxu0 %v1502_v32  ;;  %v1754_v56 = vsel %vm804_vm15, %v1744_v39, %v1746_v1 }
 0x893   : > { %1798 = vmatpush1.msra.mxu0 %v1501_v34 }
 0x894   : > { %1827 = vmatprep.subr.mxu0 %v1756_v43 }
 0x895   : > { %1828 = vmatpush2.msra.mxu0 %v1755_v8  ;;  %v1742_v35 = vpop.permute.xlu1 %1741 }
 0x896   : > { %v1753_v46 = vsel %vm804_vm15, %v1742_v35, %v1744_v39  ;;  %1829 = vmatprep.subr.mxu0 %v1754_v56 }
 0x897   : > { %1830 = vmatpush2.msra.mxu0 %v1753_v46 }
 0x898   : > { %1832 = vmatmul.mubr.f32.vlgmr.msra.gmra.mxu0 %v1473_v25 }
 0x899   : > { %2944 = vmatprep.mubr.msk.f32.mxu0 %vm467_vm4, %v1476_v59 }
 0x89c   : > { %1838 = vmatmul.mubr.f32.gmra.mxu0 %v1475_v7 }
 0x958   : > { %v1833_v47 = vpop.f32.mrf.mxu0 }
 0x959   : > { %v1844_v17 = vmax.f32 %v1833_v47, 0.0 }
 0x95a   : > { %v1835_v4 = vpop.f32.mrf.mxu0 }
 0x95b   : > { %v1845_v58 = vmax.f32 %v1835_v4, 0.0  ;;  %1857 = vrot.lane.b32.xlu0 %v1844_v17, %s3313_s30 }
 0x95c   : > { %v1839_v23 = vpop.f32.mrf.mxu0 }
 0x95d   : > { %v1846_v55 = vmax.f32 %v1839_v23, 0.0  ;;  %1859 = vrot.lane.b32.xlu1 %v1845_v58, %s3313_s30 }
 0x95e   : > { %v1841_v52 = vpop.f32.mrf.mxu0 }
 0x95f   : > { %v1847_v22 = vmax.f32 %v1841_v52, 0.0  ;;  %1861 = vrot.lane.b32.xlu0 %v1846_v55, %s3313_s30 }
 0x961   : > { %1863 = vrot.lane.b32.xlu1 %v1847_v22, %s3313_s30 }
 0x9cd   : > { %v1858_v21 = vpop.permute.xlu0 %1857 }
 0x9ce   : > { %v4397_v42 = vsel %vm378_vm0, 0.0, %v1858_v21 }
 0x9cf   : > { %v1860_v5 = vpop.permute.xlu1 %1859  ;;  %v1917_v9 = vmul.f32 %v4397_v42, %v3604_v36  ;;  %v1911_v11 = vmul.f32 %v4397_v42, %v3631_v45  ;;  %v1905_v15 = vmul.f32 %v4397_v42, %v3645_v51  ;;  %v1899_v62 = vmul.f32 %v4397_v42, %v3661_v57 }
 0x9d0   : > { %v4402_v26 = vsel %vm378_vm0, %v1860_v5, 0.0  ;;  %v1893_v28 = vmul.f32 %v4397_v42, %v3677_v63  ;;  %v1887_v13 = vmul.f32 %v4397_v42, %v4983_v31  ;;  %v1881_v29 = vmul.f32 %v4397_v42, %v4985_v6 }
 0x9d1   : > { %2091 = vrot.lane.b32.xlu1 %v1917_v9, %s3321_s13  ;;  %v1919_v50 = vmul.f32 %v4402_v26, %v3619_v41  ;;  %v1913_v20 = vmul.f32 %v4402_v26, %v3637_v48  ;;  %v1907_v61 = vmul.f32 %v4402_v26, %v3653_v54  ;;  %v1901_v44 = vmul.f32 %v4402_v26, %v3669_v60  ;;  %v1862_v49 = vpop.permute.xlu0 %1861 }
 0x9d2   : > { %v1895_v53 = vmul.f32 %v4402_v26, %v3685_v3  ;;  %v1889_v0 = vmul.f32 %v4402_v26, %v3701_v10  ;;  %v4441_v32 = vsel %vm378_vm0, %v1858_v21, %v1860_v5  ;;  %v1883_v39 = vmul.f32 %v4402_v26, %v3717_v16 }
 0x9d3   : > { %2095 = vrot.lane.b32.xlu0 %v1919_v50, %s3321_s13  ;;  %v4447_v34 = vsel %vm378_vm0, 0.0, %v1862_v49  ;;  %v1918_v43 = vmul.f32 %v4441_v32, %v3727_v19  ;;  %v1912_v1 = vmul.f32 %v4441_v32, %v3747_v24  ;;  %v1906_v56 = vmul.f32 %v4441_v32, %v3757_v27  ;;  %v1864_v4 = vpop.permute.xlu1 %1863 }
 0x9d4   : > { %v1920_v8 = vmul.f32 %v4447_v34, %v3604_v36  ;;  %v1914_v35 = vmul.f32 %v4447_v34, %v3631_v45  ;;  %v1908_v25 = vmul.f32 %v4447_v34, %v3645_v51  ;;  %v1900_v46 = vmul.f32 %v4441_v32, %v3768_v30 }
 0x9d5   : > { %2065 = vrot.lane.b32.xlu1 %v1911_v11, %s3322_s15  ;;  %v1902_v59 = vmul.f32 %v4447_v34, %v3661_v57  ;;  %v1894_v7 = vmul.f32 %v4441_v32, %v3779_v33  ;;  %v1896_v47 = vmul.f32 %v4447_v34, %v3677_v63  ;;  %v1888_v17 = vmul.f32 %v4441_v32, %v3789_v40 }
 0x9d6   : > { %v1890_v58 = vmul.f32 %v4447_v34, %v4983_v31  ;;  %v1882_v23 = vmul.f32 %v4441_v32, %v4984_v14  ;;  %v1876_v55 = vsel %vm378_vm0, %v1864_v4, 0.0  ;;  %v1884_v52 = vmul.f32 %v4447_v34, %v4985_v6 }
 0x9d7   : > { %2069 = vrot.lane.b32.xlu0 %v1913_v20, %s3322_s15  ;;  %v4493_v22 = vsel %vm378_vm0, %v1862_v49, %v1864_v4  ;;  %v1922_v21 = vmul.f32 %v1876_v55, %v3619_v41  ;;  %v1916_v9 = vmul.f32 %v1876_v55, %v3637_v48  ;;  %v1910_v11 = vmul.f32 %v1876_v55, %v3653_v54 }
 0x9d8   : > { %v1921_v5 = vmul.f32 %v4493_v22, %v3727_v19  ;;  %v1915_v50 = vmul.f32 %v4493_v22, %v3747_v24  ;;  %v1909_v20 = vmul.f32 %v4493_v22, %v3757_v27  ;;  %v1924_v49 = vmul.f32 %v4441_v32, %v4986_v18 }
 0x9d9   : > { %2039 = vrot.lane.b32.xlu1 %v1905_v15, %s3323_s21  ;;  %v1904_v15 = vmul.f32 %v1876_v55, %v3669_v60 }
 0x9db   : > { %2043 = vrot.lane.b32.xlu0 %v1907_v61, %s3323_s21  ;;  %v1903_v61 = vmul.f32 %v4493_v22, %v3768_v30 }
 0x9dd   : > { %2013 = vrot.lane.b32.xlu1 %v1899_v62, %s3324_s14  ;;  %v1898_v62 = vmul.f32 %v1876_v55, %v3685_v3 }
 0x9df   : > { %2017 = vrot.lane.b32.xlu0 %v1901_v44, %s3324_s14  ;;  %v1897_v44 = vmul.f32 %v4493_v22, %v3779_v33 }
 0x9e1   : > { %1987 = vrot.lane.b32.xlu1 %v1893_v28, %s3325_s12  ;;  %v1892_v28 = vmul.f32 %v1876_v55, %v3701_v10 }
 0x9e3   : > { %1991 = vrot.lane.b32.xlu0 %v1895_v53, %s3325_s12  ;;  %v1891_v53 = vmul.f32 %v4493_v22, %v3789_v40 }
 0x9e5   : > { %1961 = vrot.lane.b32.xlu1 %v1887_v13, %s3326_s29  ;;  %v1886_v13 = vmul.f32 %v1876_v55, %v3717_v16 }
 0x9e7   : > { %1965 = vrot.lane.b32.xlu0 %v1889_v0, %s3326_s29  ;;  %v1885_v0 = vmul.f32 %v4493_v22, %v4984_v14 }
 0x9e9   : > { %1935 = vrot.lane.b32.xlu1 %v1881_v29, %s3327_s18  ;;  %v1850_v29 = vld [vmem:[#allocation7 + $0x28] sm:$0xff] }
 0x9ea   : > { %2945 = vmatprep.mubr.msk.f32.mxu1 %vm467_vm4, %v1850_v29 }
 0x9eb   : > { %1939 = vrot.lane.b32.xlu0 %v1883_v39, %s3327_s18  ;;  %v1926_v39 = vmul.f32 %v4447_v34, %v4987_v12 }
 0x9ed   : > { %2093 = vrot.lane.b32.xlu1 %v1918_v43, %s3321_s13  ;;  %v1928_v43 = vmul.f32 %v1876_v55, %v4978_v2 }
 0x9ef   : > { %2097 = vrot.lane.b32.xlu0 %v1920_v8, %s3321_s13  ;;  %v1927_v8 = vmul.f32 %v4493_v22, %v4986_v18 }
 0x9f1   : > { %2067 = vrot.lane.b32.xlu1 %v1912_v1, %s3322_s15  ;;  %v1923_v1 = vmul.f32 %v4397_v42, %v4987_v12 }
 0x9f3   : > { %2071 = vrot.lane.b32.xlu0 %v1914_v35, %s3322_s15  ;;  %v1925_v35 = vmul.f32 %v4402_v26, %v4978_v2 }
 0x9f5   : > { %2041 = vrot.lane.b32.xlu1 %v1906_v56, %s3323_s21 }
 0x9f7   : > { %2045 = vrot.lane.b32.xlu0 %v1908_v25, %s3323_s21 }
 0x9f9   : > { %2015 = vrot.lane.b32.xlu1 %v1900_v46, %s3324_s14 }
 0x9fb   : > { %2019 = vrot.lane.b32.xlu0 %v1902_v59, %s3324_s14 }
 0x9fd   : > { %1989 = vrot.lane.b32.xlu1 %v1894_v7, %s3325_s12 }
 0x9ff   : > { %1993 = vrot.lane.b32.xlu0 %v1896_v47, %s3325_s12 }
 0xa01   : > { %1963 = vrot.lane.b32.xlu1 %v1888_v17, %s3326_s29 }
 0xa03   : > { %1967 = vrot.lane.b32.xlu0 %v1890_v58, %s3326_s29 }
 0xa05   : > { %1937 = vrot.lane.b32.xlu1 %v1882_v23, %s3327_s18 }
 0xa07   : > { %1941 = vrot.lane.b32.xlu0 %v1884_v52, %s3327_s18 }
 0xa09   : > { %2101 = vrot.lane.b32.xlu1 %v1922_v21, %s3321_s13 }
 0xa0b   : > { %2099 = vrot.lane.b32.xlu0 %v1921_v5, %s3321_s13 }
 0xa0d   : > { %2075 = vrot.lane.b32.xlu1 %v1916_v9, %s3322_s15 }
 0xa0f   : > { %2073 = vrot.lane.b32.xlu0 %v1915_v50, %s3322_s15 }
 0xa11   : > { %2049 = vrot.lane.b32.xlu1 %v1910_v11, %s3323_s21 }
 0xa13   : > { %2047 = vrot.lane.b32.xlu0 %v1909_v20, %s3323_s21 }
 0xa15   : > { %2023 = vrot.lane.b32.xlu1 %v1904_v15, %s3324_s14 }
 0xa17   : > { %2021 = vrot.lane.b32.xlu0 %v1903_v61, %s3324_s14 }
 0xa19   : > { %1997 = vrot.lane.b32.xlu1 %v1898_v62, %s3325_s12 }
 0xa1b   : > { %1995 = vrot.lane.b32.xlu0 %v1897_v44, %s3325_s12 }
 0xa1d   : > { %1971 = vrot.lane.b32.xlu1 %v1892_v28, %s3326_s29 }
 0xa1f   : > { %1969 = vrot.lane.b32.xlu0 %v1891_v53, %s3326_s29 }
 0xa21   : > { %1945 = vrot.lane.b32.xlu1 %v1886_v13, %s3327_s18 }
 0xa23   : > { %1943 = vrot.lane.b32.xlu0 %v1885_v0, %s3327_s18 }
 0xa25   : > { %2119 = vrot.lane.b32.xlu1 %v1924_v49, %s3328_s10 }
 0xa27   : > { %2123 = vrot.lane.b32.xlu0 %v1926_v39, %s3328_s10 }
 0xa29   : > { %2127 = vrot.lane.b32.xlu1 %v1928_v43, %s3328_s10 }
 0xa2b   : > { %2125 = vrot.lane.b32.xlu0 %v1927_v8, %s3328_s10 }
 0xa2d   : > { %2117 = vrot.lane.b32.xlu1 %v1923_v1, %s3328_s10 }
 0xa2f   : > { %2121 = vrot.lane.b32.xlu0 %v1925_v35, %s3328_s10 }
 0xa43   : > { %v2092_v56 = vpop.permute.xlu1 %2091 }
 0xa45   : > { %v2096_v25 = vpop.permute.xlu0 %2095 }
 0xa47   : > { %v2066_v46 = vpop.permute.xlu1 %2065 }
 0xa49   : > { %v2070_v59 = vpop.permute.xlu0 %2069 }
 0xa4b   : > { %v2040_v7 = vpop.permute.xlu1 %2039 }
 0xa4d   : > { %v2044_v47 = vpop.permute.xlu0 %2043 }
 0xa4f   : > { %v2014_v17 = vpop.permute.xlu1 %2013 }
 0xa51   : > { %v2018_v4 = vpop.permute.xlu0 %2017 }
 0xa53   : > { %v4549_v58 = vpop.permute.xlu1 %1987 }
 0xa55   : > { %v4551_v23 = vpop.permute.xlu0 %1991 }
 0xa57   : > { %v4553_v55 = vpop.permute.xlu1 %1961 }
 0xa59   : > { %v4555_v52 = vpop.permute.xlu0 %1965 }
 0xa5b   : > { %v4557_v21 = vpop.permute.xlu1 %1935 }
 0xa5d   : > { %v4559_v26 = vpop.permute.xlu0 %1939 }
 0xa5f   : > { %v2094_v5 = vpop.permute.xlu1 %2093 }
 0xa60   : > { %v2104_v35 = vsel %vm777_vm8, %v2094_v5, %v2096_v25  ;;  %v2103_v12 = vsel %vm777_vm8, %v2092_v56, %v2094_v5 }
 0xa61   : > { %v2098_v9 = vpop.permute.xlu0 %2097 }
 0xa63   : > { %v2068_v50 = vpop.permute.xlu1 %2067 }
 0xa65   : > { %v2072_v11 = vpop.permute.xlu0 %2071 }
 0xa67   : > { %v2042_v20 = vpop.permute.xlu1 %2041 }
 0xa69   : > { %v2046_v15 = vpop.permute.xlu0 %2045 }
 0xa6b   : > { %v2016_v61 = vpop.permute.xlu1 %2015 }
 0xa6d   : > { %v2020_v62 = vpop.permute.xlu0 %2019 }
 0xa6f   : > { %v1990_v44 = vpop.permute.xlu1 %1989 }
 0xa71   : > { %v1994_v28 = vpop.permute.xlu0 %1993 }
 0xa73   : > { %v4561_v53 = vpop.permute.xlu1 %1963 }
 0xa75   : > { %v1968_v13 = vpop.permute.xlu0 %1967 }
 0xa77   : > { %v4563_v0 = vpop.permute.xlu1 %1937 }
 0xa79   : > { %v4565_v49 = vpop.permute.xlu0 %1941 }
 0xa7b   : > { %v2102_v29 = vpop.permute.xlu1 %2101 }
 0xa7d   : > { %v2100_v39 = vpop.permute.xlu0 %2099 }
 0xa7e   : > { %v2105_v43 = vsel %vm777_vm8, %v2098_v9, %v2100_v39  ;;  %v2106_v8 = vsel %vm777_vm8, %v2100_v39, %v2102_v29  ;;  %v2078_v9 = vsel %vm750_vm9, %v2068_v50, %v2070_v59  ;;  %v2077_v29 = vsel %vm750_vm9, %v2066_v46, %v2068_v50 }
 0xa7f   : > { %2143 = vmatprep.subr.mxu1 %v2106_v8  ;;  %v2076_v1 = vpop.permute.xlu1 %2075  ;;  %v2026_v50 = vsel %vm696_vm11, %v2016_v61, %v2018_v4 }
 0xa80   : > { %2144 = vmatpush1.msra.mxu1 %v2105_v43 }
 0xa81   : > { %v2074_v18 = vpop.permute.xlu0 %2073  ;;  %2145 = vmatprep.subr.mxu1 %v2104_v35 }
 0xa82   : > { %v2079_v6 = vsel %vm750_vm9, %v2072_v11, %v2074_v18  ;;  %2146 = vmatpush1.msra.mxu1 %v2103_v12  ;;  %v2080_v14 = vsel %vm750_vm9, %v2074_v18, %v2076_v1  ;;  %v2052_v12 = vsel %vm723_vm10, %v2042_v20, %v2044_v47  ;;  %v1948_v1 = vsel %vm615_vm14, %v4563_v0, %v4559_v26 }
 0xa83   : > { %2147 = vmatprep.subr.mxu1 %v2080_v14  ;;  %v2050_v31 = vpop.permute.xlu1 %2049  ;;  %v2051_v14 = vsel %vm723_vm10, %v2040_v7, %v2042_v20  ;;  %v1877_v26 = vmul.f32 %v4397_v42, %v3901_v38  ;;  %v4988_v42 = vmov 0.0  }
 0xa84   : > { %2148 = vmatpush1.msra.mxu1 %v2079_v6 }
 0xa85   : > { %v2048_v39 = vpop.permute.xlu0 %2047  ;;  %2149 = vmatprep.subr.mxu1 %v2078_v9  ;;  %v1878_v9 = vmul.f32 %v4441_v32, %v3896_v37 }
 0xa86   : > { %v2053_v25 = vsel %vm723_vm10, %v2046_v15, %v2048_v39  ;;  %2150 = vmatpush1.msra.mxu1 %v2077_v29  ;;  %v2054_v56 = vsel %vm723_vm10, %v2048_v39, %v2050_v31  ;;  %v2025_v31 = vsel %vm696_vm11, %v2014_v17, %v2016_v61  ;;  %v2000_v15 = vsel %vm669_vm12, %v1990_v44, %v4551_v23 }
 0xa87   : > { %2151 = vmatprep.subr.mxu1 %v2054_v56  ;;  %v2024_v5 = vpop.permute.xlu1 %2023  ;;  %v1973_v23 = vsel %vm642_vm13, %v4553_v55, %v4561_v53  ;;  %v1852_v56 = vld [vmem:[#allocation7 + $0x38] sm:$0xff] }
 0xa88   : > { %2152 = vmatpush1.msra.mxu1 %v2053_v25  ;;  %v1849_v25 = vld [vmem:[#allocation7 + $0x20] sm:$0xff] }
 0xa89   : > { %v2022_v18 = vpop.permute.xlu0 %2021  ;;  %2153 = vmatprep.subr.mxu1 %v2052_v12 }
 0xa8a   : > { %v2027_v6 = vsel %vm696_vm11, %v2020_v62, %v2022_v18  ;;  %2154 = vmatpush1.msra.mxu1 %v2051_v14  ;;  %v2028_v46 = vsel %vm696_vm11, %v2022_v18, %v2024_v5  ;;  %v1999_v62 = vsel %vm669_vm12, %v4549_v58, %v1990_v44  ;;  %v1851_v5 = vld [vmem:[#allocation7 + $0x30] sm:$0xff] }
 0xa8b   : > { %2155 = vmatprep.subr.mxu1 %v2028_v46  ;;  %v1998_v59 = vpop.permute.xlu1 %1997 }
 0xa8c   : > { %2156 = vmatpush1.msra.mxu1 %v2027_v6 }
 0xa8d   : > { %v1996_v11 = vpop.permute.xlu0 %1995  ;;  %2157 = vmatprep.subr.mxu1 %v2026_v50 }
 0xa8e   : > { %v2001_v47 = vsel %vm669_vm12, %v1994_v28, %v1996_v11  ;;  %2158 = vmatpush1.msra.mxu1 %v2025_v31  ;;  %v2002_v7 = vsel %vm669_vm12, %v1996_v11, %v1998_v59  ;;  %v1974_v28 = vsel %vm642_vm13, %v4561_v53, %v4555_v52  ;;  %v1947_v52 = vsel %vm615_vm14, %v4557_v21, %v4563_v0 }
 0xa8f   : > { %2159 = vmatprep.subr.mxu1 %v2002_v7  ;;  %v1972_v20 = vpop.permute.xlu1 %1971  ;;  %v1880_v53 = vmul.f32 %v4493_v22, %v3896_v37  ;;  %v2229_v7 = vld [vmem:[#allocation8 + $0x4] sm:$0xf] }
 0xa90   : > { %2160 = vmatpush1.msra.mxu1 %v2001_v47 }
 0xa91   : > { %v1970_v43 = vpop.permute.xlu0 %1969  ;;  %2161 = vmatprep.subr.mxu1 %v2000_v15 }
 0xa92   : > { %v1975_v17 = vsel %vm642_vm13, %v1968_v13, %v1970_v43  ;;  %2162 = vmatpush1.msra.mxu1 %v1999_v62  ;;  %v1976_v4 = vsel %vm642_vm13, %v1970_v43, %v1972_v20  ;;  %v2948_v20 = vld [vmem:[%s4916_s5 + $0x10] sm:$0xff] }
 0xa93   : > { %2163 = vmatprep.subr.mxu1 %v1976_v4  ;;  %v1946_v61 = vpop.permute.xlu1 %1945 }
 0xa94   : > { %2164 = vmatpush1.msra.mxu1 %v1975_v17  ;;  %v2949_v17 = vld [vmem:[%s4916_s5 + $0x18] sm:$0xff] }
 0xa95   : > { %v1944_v8 = vpop.permute.xlu0 %1943  ;;  %2165 = vmatprep.subr.mxu1 %v1974_v28 }
 0xa96   : > { %v1949_v58 = vsel %vm615_vm14, %v4565_v49, %v1944_v8  ;;  %2166 = vmatpush1.msra.mxu1 %v1973_v23  ;;  %v1950_v44 = vsel %vm615_vm14, %v1944_v8, %v1946_v61  ;;  %v1879_v49 = vmul.f32 %v4447_v34, %v3901_v38 }
 0xa97   : > { %2167 = vmatprep.subr.mxu1 %v1950_v44  ;;  %v2120_v13 = vpop.permute.xlu1 %2119 }
 0xa98   : > { %2168 = vmatpush1.msra.mxu1 %v1949_v58 }
 0xa99   : > { %v2124_v55 = vpop.permute.xlu0 %2123  ;;  %2169 = vmatprep.subr.mxu1 %v1948_v1 }
 0xa9a   : > { %2170 = vmatpush1.msra.mxu1 %v1947_v52 }
 0xa9b   : > { %2171 = vmatprep.subr.mxu1 %v1880_v53  ;;  %v2128_v35 = vpop.permute.xlu1 %2127 }
 0xa9c   : > { %2172 = vmatpush1.msra.mxu1 %v1879_v49 }
 0xa9d   : > { %v2126_v29 = vpop.permute.xlu0 %2125  ;;  %2173 = vmatprep.subr.mxu1 %v1878_v9 }
 0xa9e   : > { %v2131_v21 = vsel %vm804_vm15, %v2124_v55, %v2126_v29  ;;  %2174 = vmatpush1.msra.mxu1 %v1877_v26  ;;  %v2132_v22 = vsel %vm804_vm15, %v2126_v29, %v2128_v35  ;;  %v4989_v29 = vld [vmem:[#allocation19_spill] sm:$0xff] }
 0xa9f   : > { %2203 = vmatprep.subr.mxu1 %v2132_v22  ;;  %v2118_v0 = vpop.permute.xlu1 %2117  ;;  %v4990_v22 = vld [vmem:[#allocation21_spill] sm:$0xff] }
 0xaa0   : > { %2204 = vmatpush2.msra.mxu1 %v2131_v21  ;;  %v2129_v32 = vsel %vm804_vm15, %v2118_v0, %v2120_v13 }
 0xaa1   : > { %v2122_v34 = vpop.permute.xlu0 %2121 }
 0xaa2   : > { %v2130_v39 = vsel %vm804_vm15, %v2120_v13, %v2122_v34 }
 0xaa3   : > { %2205 = vmatprep.subr.mxu1 %v2130_v39 }
 0xaa4   : > { %2206 = vmatpush2.msra.mxu1 %v2129_v32 }
 0xaa5   : > { %2208 = vmatmul.mubr.f32.vlgmr.msra.gmra.mxu1 %v1849_v25  ;;  %2986 = vmatprep.subr.mxu1 %v4988_v42  ;;  %v4991_v25 = vld [vmem:[#allocation22_spill] sm:$0xff] }
 0xaa6   : > { %2946 = vmatprep.mubr.msk.f32.mxu1 %vm467_vm4, %v1852_v56  ;;  %v4992_v56 = vld [vmem:[#allocation23_spill] sm:$0xff] }
 0xaa9   : > { %2214 = vmatmul.mubr.f32.gmra.mxu1 %v1851_v5 }
 0xaaa   : > { %2990 = vmatprep.mubr.msk.f32.mxu1 %vm3330_vm1, %v4988_v42 }
 0xb65   : > { %v2209_v12 = vpop.f32.mrf.mxu1 }
 0xb67   : > { %v2211_v14 = vpop.f32.mrf.mxu1 }
 0xb68   : > { %v2220_v18 = vadd.f32 %v2211_v14, %v2209_v12 }
 0xb69   : > { %v2215_v6 = vpop.f32.mrf.mxu1 }
 0xb6a   : > { %2221 = vadd.xlane.f32.xlu1 %v2220_v18 }
 0xb6b   : > { %v2217_v46 = vpop.f32.mrf.mxu1 }
 0xb6c   : > { %v2223_v59 = vadd.f32 %v2217_v46, %v2215_v6 }
 0xb6e   : > { %2224 = vadd.xlane.f32.xlu0 %v2223_v59 }
 0xbf3   : > { %v2222_v50 = vpop.xlane.xlu1 %2221 }
 0xbf4   : > { %v2226_v47 = vmul.f32 0.00390625, %v2222_v50 }
 0xbf7   : > { %v2225_v31 = vpop.xlane.xlu0 %2224 }
 0xbf8   : > { %v2227_v11 = vmul.f32 0.00390625, %v2225_v31 }
 0xbfa   : > { %2987 = vmatpush3.msra.mxu1 %v2227_v11 }
 0xbfb   : > { %2988 = vmatprep.subr.mxu1 %v4988_v42 }
 0xbfc   : > { %2989 = vmatpush3.msra.mxu1 %v2226_v47 }
 0xbfd   : > { %2991 = vmatmul.mubr.msk.f32.vlgmr.msra.gmra.mxu1 %vm467_vm4, %v2229_v7 }
 0xbfe   : > { %2995 = vmatprep.mubr.msk.f32.mxu1 %vm1356_vm2, %v2948_v20 }
 0xcbd   : > { %v2299_v15 = vpop.f32.mrf.mxu1 }
 0xcbe   : > { %v2303_v62 = vmax.f32 %v2299_v15, 0.0 }
 0xcbf   : > { %v2992_v43 = vpop.f32.mrf.mxu1 }
 0xcc0   : > { %2993 = vmatprep.subr.msk.mxu1 %vm1363_vm3, %v2303_v62 }
 0xcc1   : > { %2994 = vmatpush3.msk.msra.mxu1 %vm1363_vm3, %v2303_v62 }
 0xcc2   : > { %2996 = vmatmul.mubr.msk.f32.vlgmr.msra.gmra.mxu1 %vm1356_vm2, %v2949_v17 }
 0xd82   : > { %v2997_v4 = vpop.f32.mrf.mxu1 }
 0xd83   : > { %v2392_v61 = vsub.f32 0.0, %v2997_v4 }
 0xd84   : > { %v2382_v28 = vpop.f32.mrf.mxu1 }
 0xd85   : > { %v2395_v23 = vmul.f32 1.442695, %v2392_v61  ;;  %v2391_v8 = vsub.f32 0.0, %v2382_v28 }
 0xd87   : > { %3109 = vpow2.f32 %v2395_v23  ;;  %v2393_v58 = vmul.f32 1.442695, %v2391_v8 }
 0xd89   : > { %3111 = vpow2.f32 %v2393_v58 }
 0xd94   : > { %v3110_v44 = vpop.eup %3109 }
 0xd95   : > { %v2398_v13 = vadd.f32 1.0, %v3110_v44 }
 0xd96   : > { %v3112_v1 = vpop.eup %3111 }
 0xd97   : > { %3113 = vrcp.f32 %v2398_v13  ;;  %v2397_v52 = vadd.f32 1.0, %v3112_v1 }
 0xd99   : > { %3115 = vrcp.f32 %v2397_v52 }
 0xda4   : > { %v3114_v55 = vpop.eup %3113 }
 0xda5   : > { %2410 = vperm.xlu0 %3099, %v3114_v55  }
 0xda6   : > { %v3116_v53 = vpop.eup %3115 }
 0xda7   : > { %2405 = vperm.xlu1 %3100, %v3116_v53  }
 0xe20   : > { %v2411_v49 = vpop.permute.xlu0 %2410 }
 0xe21   : > { %v2415_v35 = vmul.f32 %v2411_v49, %v2215_v6  ;;  %v2416_v9 = vmul.f32 %v2411_v49, %v2217_v46 }
 0xe22   : > { %v2406_v26 = vpop.permute.xlu1 %2405 }
 0xe23   : > { %v2419_v21 = vadd.f32 %v2415_v35, %v4989_v29  ;;  %v2420_v0 = vadd.f32 %v2416_v9, %v4990_v22  ;;  %v2413_v34 = vmul.f32 %v2406_v26, %v2209_v12  ;;  %v2414_v39 = vmul.f32 %v2406_v26, %v2211_v14  ;;  %v4993_v35 = vld [vmem:[#allocation15_spill] sm:$0xff]  ;;  %v4994_v26 = vld [vmem:[#allocation17_spill] sm:$0xff] }
 0xe25   : > { %2433 = vrot.lane.b32.xlu0 %v2419_v21, %s3313_s30  ;;  %2435 = vrot.lane.b32.xlu1 %v2420_v0, %s3313_s30  ;;  %v2417_v32 = vadd.f32 %v2413_v34, %v4991_v25  ;;  %v2418_v42 = vadd.f32 %v2414_v39, %v4992_v56  ;;  %v4995_v21 = vld [vmem:[#allocation16_spill] sm:$0xff] }
 0xe26   : > { %v4996_v0 = vld [vmem:[#allocation20_spill] sm:$0xff] }
 0xe29   : > { %2431 = vrot.lane.b32.xlu1 %v2418_v42, %s3313_s30  ;;  %2429 = vrot.lane.b32.xlu0 %v2417_v32, %s3313_s30 }
 0xe97   : > { %v2434_v5 = vpop.permute.xlu0 %2433  ;;  %v2436_v18 = vpop.permute.xlu1 %2435 }
 0xe98   : > { %v4643_v6 = vsel %vm378_vm0, %v2434_v5, %v2436_v18  ;;  %v2448_v12 = vsel %vm378_vm0, %v2436_v18, 0.0  ;;  %v4650_v59 = vsel %vm378_vm0, 0.0, %v2434_v5 }
 0xe99   : > { %v2494_v14 = vmul.f32 %v2448_v12, %v3619_v41  ;;  %v2493_v46 = vmul.f32 %v4643_v6, %v3727_v19  ;;  %v2488_v50 = vmul.f32 %v2448_v12, %v3637_v48  ;;  %v2492_v31 = vmul.f32 %v4650_v59, %v3604_v36 }
 0xe9a   : > { %v2482_v11 = vmul.f32 %v2448_v12, %v3653_v54  ;;  %v2487_v47 = vmul.f32 %v4643_v6, %v3747_v24  ;;  %v2476_v7 = vmul.f32 %v2448_v12, %v3669_v60  ;;  %v2486_v20 = vmul.f32 %v4650_v59, %v3631_v45 }
 0xe9b   : > { %2673 = vrot.lane.b32.xlu1 %v2494_v14, %s3321_s13  ;;  %2671 = vrot.lane.b32.xlu0 %v2493_v46, %s3321_s13  ;;  %v2470_v15 = vmul.f32 %v2448_v12, %v3685_v3  ;;  %v2481_v62 = vmul.f32 %v4643_v6, %v3757_v27  ;;  %v2464_v43 = vmul.f32 %v2448_v12, %v3701_v10  ;;  %v2430_v28 = vpop.permute.xlu0 %2429  ;;  %v2432_v23 = vpop.permute.xlu1 %2431 }
 0xe9c   : > { %v2480_v17 = vmul.f32 %v4650_v59, %v3645_v51  ;;  %v2458_v4 = vmul.f32 %v2448_v12, %v3717_v16  ;;  %v2475_v61 = vmul.f32 %v4643_v6, %v3768_v30  ;;  %v2500_v8 = vmul.f32 %v2448_v12, %v4978_v2 }
 0xe9d   : > { %v2474_v58 = vmul.f32 %v4650_v59, %v3661_v57  ;;  %v4688_v44 = vsel %vm378_vm0, %v2430_v28, %v2432_v23  ;;  %v2469_v13 = vmul.f32 %v4643_v6, %v3779_v33  ;;  %v4697_v52 = vsel %vm378_vm0, 0.0, %v2430_v28 }
 0xe9e   : > { %v2490_v1 = vmul.f32 %v4688_v44, %v3727_v19  ;;  %v2468_v55 = vmul.f32 %v4650_v59, %v3677_v63  ;;  %v2489_v53 = vmul.f32 %v4697_v52, %v3604_v36  ;;  %v2463_v19 = vmul.f32 %v4643_v6, %v3789_v40 }
 0xe9f   : > { %2647 = vrot.lane.b32.xlu1 %v2488_v50, %s3322_s15  ;;  %2669 = vrot.lane.b32.xlu0 %v2492_v31, %s3321_s13  ;;  %v2484_v49 = vmul.f32 %v4688_v44, %v3747_v24  ;;  %v2462_v9 = vmul.f32 %v4650_v59, %v4993_v35  ;;  %v2483_v36 = vmul.f32 %v4697_v52, %v3631_v45  ;;  %v2447_v39 = vsel %vm378_vm0, %v2432_v23, 0.0 }
 0xea0   : > { %v2457_v29 = vmul.f32 %v4643_v6, %v4994_v26  ;;  %v2478_v24 = vmul.f32 %v4688_v44, %v3757_v27  ;;  %v2456_v22 = vmul.f32 %v4650_v59, %v4995_v21  ;;  %v2477_v45 = vmul.f32 %v4697_v52, %v3645_v51 }
 0xea1   : > { %v2499_v34 = vmul.f32 %v4643_v6, %v4996_v0  ;;  %v2472_v27 = vmul.f32 %v4688_v44, %v3768_v30  ;;  %v2491_v25 = vmul.f32 %v2447_v39, %v3619_v41  ;;  %v2471_v51 = vmul.f32 %v4697_v52, %v3661_v57 }
 0xea2   : > { %v2485_v32 = vmul.f32 %v2447_v39, %v3637_v48  ;;  %v2466_v30 = vmul.f32 %v4688_v44, %v3779_v33  ;;  %v2479_v56 = vmul.f32 %v2447_v39, %v3653_v54  ;;  %v2465_v41 = vmul.f32 %v4697_v52, %v3677_v63 }
 0xea3   : > { %2621 = vrot.lane.b32.xlu1 %v2482_v11, %s3323_s21  ;;  %2645 = vrot.lane.b32.xlu0 %v2487_v47, %s3322_s15  ;;  %v2473_v57 = vmul.f32 %v2447_v39, %v3669_v60  ;;  %v2460_v48 = vmul.f32 %v4688_v44, %v3789_v40  ;;  %v2467_v33 = vmul.f32 %v2447_v39, %v3685_v3  ;;  %v2422_v3 = vld [vmem:[%s4917_s6 + $0x8] sm:$0xff] }
 0xea4   : > { %v2459_v54 = vmul.f32 %v4697_v52, %v4993_v35  ;;  %v2461_v63 = vmul.f32 %v2447_v39, %v3701_v10  ;;  %v2454_v60 = vmul.f32 %v4688_v44, %v4994_v26  ;;  %v2455_v40 = vmul.f32 %v2447_v39, %v3717_v16  ;;  %2953 = vmatprep.mubr.msk.f32.mxu0 %vm467_vm4, %v2422_v3  ;;  %v4997_v10 = vld [vmem:[#allocation18_spill] sm:$0xff] }
 0xea5   : > { %v2453_v42 = vmul.f32 %v4697_v52, %v4995_v21  ;;  %v2498_v5 = vmul.f32 %v4650_v59, %v4997_v10  ;;  %v2496_v18 = vmul.f32 %v4688_v44, %v4996_v0  ;;  %v2497_v16 = vmul.f32 %v2447_v39, %v4978_v2 }
 0xea6   : > { %v2495_v12 = vmul.f32 %v4697_v52, %v4997_v10 }
 0xea7   : > { %2595 = vrot.lane.b32.xlu1 %v2476_v7, %s3324_s14  ;;  %2643 = vrot.lane.b32.xlu0 %v2486_v20, %s3322_s15 }
 0xeab   : > { %2569 = vrot.lane.b32.xlu1 %v2470_v15, %s3325_s12  ;;  %2619 = vrot.lane.b32.xlu0 %v2481_v62, %s3323_s21 }
 0xeaf   : > { %2543 = vrot.lane.b32.xlu1 %v2464_v43, %s3326_s29  ;;  %2617 = vrot.lane.b32.xlu0 %v2480_v17, %s3323_s21 }
 0xeb3   : > { %2517 = vrot.lane.b32.xlu1 %v2458_v4, %s3327_s18  ;;  %2593 = vrot.lane.b32.xlu0 %v2475_v61, %s3324_s14 }
 0xeb7   : > { %2699 = vrot.lane.b32.xlu1 %v2500_v8, %s3328_s10  ;;  %2591 = vrot.lane.b32.xlu0 %v2474_v58, %s3324_s14 }
 0xebb   : > { %2567 = vrot.lane.b32.xlu0 %v2469_v13, %s3325_s12  ;;  %2665 = vrot.lane.b32.xlu1 %v2490_v1, %s3321_s13 }
 0xebf   : > { %2565 = vrot.lane.b32.xlu0 %v2468_v55, %s3325_s12  ;;  %2663 = vrot.lane.b32.xlu1 %v2489_v53, %s3321_s13 }
 0xec3   : > { %2541 = vrot.lane.b32.xlu0 %v2463_v19, %s3326_s29  ;;  %2639 = vrot.lane.b32.xlu1 %v2484_v49, %s3322_s15 }
 0xec7   : > { %2539 = vrot.lane.b32.xlu0 %v2462_v9, %s3326_s29  ;;  %2637 = vrot.lane.b32.xlu1 %v2483_v36, %s3322_s15 }
 0xecb   : > { %2515 = vrot.lane.b32.xlu0 %v2457_v29, %s3327_s18  ;;  %2613 = vrot.lane.b32.xlu1 %v2478_v24, %s3323_s21 }
 0xecf   : > { %2513 = vrot.lane.b32.xlu0 %v2456_v22, %s3327_s18  ;;  %2611 = vrot.lane.b32.xlu1 %v2477_v45, %s3323_s21 }
 0xed3   : > { %2697 = vrot.lane.b32.xlu0 %v2499_v34, %s3328_s10  ;;  %2587 = vrot.lane.b32.xlu1 %v2472_v27, %s3324_s14 }
 0xed7   : > { %2667 = vrot.lane.b32.xlu0 %v2491_v25, %s3321_s13  ;;  %2585 = vrot.lane.b32.xlu1 %v2471_v51, %s3324_s14  ;;  %s4867_s13 = scalar_lea.hbm %s4918_s7, %s2961_s16 }
 0xedb   : > { %2641 = vrot.lane.b32.xlu0 %v2485_v32, %s3322_s15  ;;  %2561 = vrot.lane.b32.xlu1 %v2466_v30, %s3325_s12  ;;  %s2797_s15 = scalar_lea.sflag [#allocation4], %s3518_s19 }
 0xedf   : > { %2615 = vrot.lane.b32.xlu0 %v2479_v56, %s3323_s21  ;;  %2559 = vrot.lane.b32.xlu1 %v2465_v41, %s3325_s12  ;;  %s3332_s21 = smov [#allocation10]  }
 0xee3   : > { %2589 = vrot.lane.b32.xlu0 %v2473_v57, %s3324_s14  ;;  %2535 = vrot.lane.b32.xlu1 %v2460_v48, %s3326_s29  ;;  %s3235_s14 = sshll.u32 %s3332_s21, 4  ;;  %s3236_s14 = int_to_ptr.vmem [resolvable:$false] %s3235_s14 }
 0xee7   : > { %2563 = vrot.lane.b32.xlu0 %v2467_v33, %s3325_s12  ;;  %2533 = vrot.lane.b32.xlu1 %v2459_v54, %s3326_s29  ;;  %s3237_s12 = scalar_lea.vmem %s3236_s14, 1024 }
 0xeeb   : > { %2537 = vrot.lane.b32.xlu0 %v2461_v63, %s3326_s29  ;;  %2509 = vrot.lane.b32.xlu1 %v2454_v60, %s3327_s18 }
 0xeef   : > { %2511 = vrot.lane.b32.xlu0 %v2455_v40, %s3327_s18  ;;  %2507 = vrot.lane.b32.xlu1 %v2453_v42, %s3327_s18 }
 0xef3   : > { %2695 = vrot.lane.b32.xlu0 %v2498_v5, %s3328_s10  ;;  %2691 = vrot.lane.b32.xlu1 %v2496_v18, %s3328_s10 }
 0xef7   : > { %2693 = vrot.lane.b32.xlu0 %v2497_v16, %s3328_s10  ;;  %2689 = vrot.lane.b32.xlu1 %v2495_v12, %s3328_s10  ;;  %s4998_s10 = sshll.u32 %s3518_s19, 5 }
 0xef8   : > { %s340_s2 = scalar_lea.vmem [#allocation10], %s4998_s10 }
 0xef9   : > { %s2810_s11 = sshll.u32 %s340_s2, 4  ;;  %s4861_s11 = int_to_ptr.vmem [resolvable:$true] %s2810_s11 }
 0xefa   : > { %s3231_s28 = scalar_lea.vmem %s4861_s11, 512  ;;  %p3238_p13 = scmp.lt.s32.totalorder %s4861_s11, %s3236_s14 }
 0xefb   : > { %p3232_p7 = scmp.ne.s32.totalorder %s4861_s11, %s3231_s28  ;;  %p3239_p0 = scmp.lt.s32.totalorder %s3237_s12, %s3231_s28 }
 0xefd   : > { %p3233_p12 = pnand %p3232_p7, %p4999_p1  ;;  %p3240_p2 = por %p3239_p0, %p3238_p13 }
 0xeff   : > { %p3234_p9 = pneg %p3233_p12 }
 0xf01   : > { %p3241_p10 = pnand %p3240_p2, %p3234_p9 }
 0xf0d   : > { %v2672_v14 = vpop.permute.xlu0 %2671  ;;  %v2674_v46 = vpop.permute.xlu1 %2673 }
 0xf0e   : > { %v2678_v50 = vsel %vm777_vm8, %v2672_v14, %v2674_v46 }
 0xf0f   : > { %2715 = vmatprep.subr.mxu0 %v2678_v50 }
 0xf11   : > { %v2670_v31 = vpop.permute.xlu0 %2669  ;;  %v2648_v11 = vpop.permute.xlu1 %2647 }
 0xf12   : > { %v2677_v47 = vsel %vm777_vm8, %v2670_v31, %v2672_v14 }
 0xf13   : > { %2716 = vmatpush1.msra.mxu0 %v2677_v47 }
 0xf15   : > { %v2646_v7 = vpop.permute.xlu0 %2645  ;;  %v2622_v20 = vpop.permute.xlu1 %2621 }
 0xf16   : > { %v2652_v27 = vsel %vm750_vm9, %v2646_v7, %v2648_v11 }
 0xf19   : > { %v2644_v2 = vpop.permute.xlu0 %2643  ;;  %v2596_v15 = vpop.permute.xlu1 %2595 }
 0xf1a   : > { %v2651_v39 = vsel %vm750_vm9, %v2644_v2, %v2646_v7 }
 0xf1d   : > { %v2620_v62 = vpop.permute.xlu0 %2619  ;;  %v2570_v43 = vpop.permute.xlu1 %2569 }
 0xf1e   : > { %v2626_v56 = vsel %vm723_vm10, %v2620_v62, %v2622_v20 }
 0xf21   : > { %v2618_v17 = vpop.permute.xlu0 %2617  ;;  %v4790_v4 = vpop.permute.xlu1 %2543 }
 0xf22   : > { %v2625_v41 = vsel %vm723_vm10, %v2618_v17, %v2620_v62 }
 0xf25   : > { %v2594_v61 = vpop.permute.xlu0 %2593  ;;  %v4792_v28 = vpop.permute.xlu1 %2517 }
 0xf26   : > { %v2600_v63 = vsel %vm696_vm11, %v2594_v61, %v2596_v15 }
 0xf29   : > { %v2592_v23 = vpop.permute.xlu0 %2591  ;;  %v4794_v8 = vpop.permute.xlu1 %2699 }
 0xf2a   : > { %v2599_v60 = vsel %vm696_vm11, %v2592_v23, %v2594_v61  ;;  %v2452_v61 = vmul.f32 %v4643_v6, %v3896_v37  ;;  %v2451_v23 = vmul.f32 %v4650_v59, %v3901_v38 }
 0xf2d   : > { %v2568_v58 = vpop.permute.xlu0 %2567  ;;  %v2666_v13 = vpop.permute.xlu1 %2665 }
 0xf2e   : > { %v2574_v5 = vsel %vm669_vm12, %v2568_v58, %v2570_v43 }
 0xf31   : > { %v2566_v1 = vpop.permute.xlu0 %2565  ;;  %v2664_v55 = vpop.permute.xlu1 %2663 }
 0xf32   : > { %v2675_v34 = vsel %vm777_vm8, %v2664_v55, %v2666_v13  ;;  %v2573_v18 = vsel %vm669_vm12, %v2566_v1, %v2568_v58  ;;  %v2449_v1 = vmul.f32 %v4697_v52, %v3901_v38  ;;  %v2421_v38 = vld [vmem:[%s4917_s6] sm:$0xff]  ;;  %v2424_v52 = vld [vmem:[%s4917_s6 + $0x18] sm:$0xff] }
 0xf35   : > { %v2542_v53 = vpop.permute.xlu0 %2541  ;;  %v2640_v19 = vpop.permute.xlu1 %2639 }
 0xf36   : > { %v2548_v50 = vsel %vm642_vm13, %v2542_v53, %v4790_v4 }
 0xf39   : > { %v2540_v49 = vpop.permute.xlu0 %2539  ;;  %v2638_v35 = vpop.permute.xlu1 %2637 }
 0xf3a   : > { %v2649_v30 = vsel %vm750_vm9, %v2638_v35, %v2640_v19  ;;  %v2547_v31 = vsel %vm642_vm13, %v2540_v49, %v2542_v53  ;;  %v3121_v49 = vld [vmem:[%s3524_s20] sm:$0xff] }
 0xf3d   : > { %v4796_v9 = vpop.permute.xlu0 %2515  ;;  %v2614_v36 = vpop.permute.xlu1 %2613 }
 0xf3e   : > { %v2522_v2 = vsel %vm615_vm14, %v4796_v9, %v4792_v28 }
 0xf41   : > { %v2514_v26 = vpop.permute.xlu0 %2513  ;;  %v2612_v29 = vpop.permute.xlu1 %2611 }
 0xf42   : > { %v2623_v54 = vsel %vm723_vm10, %v2612_v29, %v2614_v36  ;;  %v2521_v15 = vsel %vm615_vm14, %v2514_v26, %v4796_v9 }
 0xf45   : > { %v4798_v24 = vpop.permute.xlu0 %2697  ;;  %v2588_v21 = vpop.permute.xlu1 %2587 }
 0xf46   : > { %v2704_v6 = vsel %vm804_vm15, %v4798_v24, %v4794_v8  ;;  %v2423_v8 = vld [vmem:[%s4917_s6 + $0x10] sm:$0xff] }
 0xf49   : > { %v2668_v22 = vpop.permute.xlu0 %2667  ;;  %v2586_v45 = vpop.permute.xlu1 %2585 }
 0xf4a   : > { %v2676_v0 = vsel %vm777_vm8, %v2666_v13, %v2668_v22  ;;  %v2597_v10 = vsel %vm696_vm11, %v2586_v45, %v2588_v21  ;;  %v2450_v13 = vmul.f32 %v4688_v44, %v3896_v37  ;;  %v3124_v45 = vld [vmem:[%s3524_s20 + $0x18] sm:$0xff] }
 0xf4b   : > { %2717 = vmatprep.subr.mxu0 %v2676_v0 }
 0xf4c   : > { %2718 = vmatpush1.msra.mxu0 %v2675_v34 }
 0xf4d   : > { %v2642_v25 = vpop.permute.xlu0 %2641  ;;  %2719 = vmatprep.subr.mxu0 %v2652_v27  ;;  %v2562_v51 = vpop.permute.xlu1 %2561 }
 0xf4e   : > { %2720 = vmatpush1.msra.mxu0 %v2651_v39  ;;  %v2650_v32 = vsel %vm750_vm9, %v2640_v19, %v2642_v25 }
 0xf4f   : > { %2721 = vmatprep.subr.mxu0 %v2650_v32 }
 0xf50   : > { %2722 = vmatpush1.msra.mxu0 %v2649_v30 }
 0xf51   : > { %v2616_v57 = vpop.permute.xlu0 %2615  ;;  %2723 = vmatprep.subr.mxu0 %v2626_v56  ;;  %v2560_v48 = vpop.permute.xlu1 %2559 }
 0xf52   : > { %2724 = vmatpush1.msra.mxu0 %v2625_v41  ;;  %v2624_v33 = vsel %vm723_vm10, %v2614_v36, %v2616_v57  ;;  %v2571_v46 = vsel %vm669_vm12, %v2560_v48, %v2562_v51  ;;  %v3122_v36 = vld [vmem:[%s3524_s20 + $0x8] sm:$0xff] }
 0xf53   : > { %2725 = vmatprep.subr.mxu0 %v2624_v33 }
 0xf54   : > { %2726 = vmatpush1.msra.mxu0 %v2623_v54 }
 0xf55   : > { %v2590_v3 = vpop.permute.xlu0 %2589  ;;  %2727 = vmatprep.subr.mxu0 %v2600_v63  ;;  %v2536_v40 = vpop.permute.xlu1 %2535 }
 0xf56   : > { %2728 = vmatpush1.msra.mxu0 %v2599_v60  ;;  %v2598_v42 = vsel %vm696_vm11, %v2588_v21, %v2590_v3 }
 0xf57   : > { %2729 = vmatprep.subr.mxu0 %v2598_v42 }
 0xf58   : > { %2730 = vmatpush1.msra.mxu0 %v2597_v10 }
 0xf59   : > { %v2564_v16 = vpop.permute.xlu0 %2563  ;;  %2731 = vmatprep.subr.mxu0 %v2574_v5  ;;  %v2534_v12 = vpop.permute.xlu1 %2533 }
 0xf5a   : > { %2732 = vmatpush1.msra.mxu0 %v2573_v18  ;;  %v2572_v14 = vsel %vm669_vm12, %v2562_v51, %v2564_v16  ;;  %v2545_v20 = vsel %vm642_vm13, %v2534_v12, %v2536_v40 }
 0xf5b   : > { %2733 = vmatprep.subr.mxu0 %v2572_v14 }
 0xf5c   : > { %2734 = vmatpush1.msra.mxu0 %v2571_v46 }
 0xf5d   : > { %v2538_v11 = vpop.permute.xlu0 %2537  ;;  %2735 = vmatprep.subr.mxu0 %v2548_v50  ;;  %v2510_v47 = vpop.permute.xlu1 %2509 }
 0xf5e   : > { %2736 = vmatpush1.msra.mxu0 %v2547_v31  ;;  %v2546_v7 = vsel %vm642_vm13, %v2536_v40, %v2538_v11 }
 0xf5f   : > { %2737 = vmatprep.subr.mxu0 %v2546_v7 }
 0xf60   : > { %2738 = vmatpush1.msra.mxu0 %v2545_v20 }
 0xf61   : > { %v2512_v62 = vpop.permute.xlu0 %2511  ;;  %2739 = vmatprep.subr.mxu0 %v2522_v2  ;;  %v2508_v43 = vpop.permute.xlu1 %2507 }
 0xf62   : > { %v2519_v17 = vsel %vm615_vm14, %v2508_v43, %v2510_v47  ;;  %2740 = vmatpush1.msra.mxu0 %v2521_v15  ;;  %v2520_v4 = vsel %vm615_vm14, %v2510_v47, %v2512_v62 }
 0xf63   : > { %2741 = vmatprep.subr.mxu0 %v2520_v4 }
 0xf64   : > { %2742 = vmatpush1.msra.mxu0 %v2519_v17 }
 0xf65   : > { %v2696_v28 = vpop.permute.xlu0 %2695  ;;  %2743 = vmatprep.subr.mxu0 %v2452_v61  ;;  %v2692_v58 = vpop.permute.xlu1 %2691 }
 0xf66   : > { %2744 = vmatpush1.msra.mxu0 %v2451_v23  ;;  %v2703_v55 = vsel %vm804_vm15, %v2696_v28, %v4798_v24  ;;  %v3123_v24 = vld [vmem:[%s3524_s20 + $0x10] sm:$0xff] }
 0xf67   : > { %2745 = vmatprep.subr.mxu0 %v2450_v13 }
 0xf68   : > { %2746 = vmatpush1.msra.mxu0 %v2449_v1 }
 0xf69   : > { %v2694_v59 = vpop.permute.xlu0 %2693  ;;  %2775 = vmatprep.subr.mxu0 %v2704_v6  ;;  %v2690_v53 = vpop.permute.xlu1 %2689 }
 0xf6a   : > { %v2701_v37 = vsel %vm804_vm15, %v2690_v53, %v2692_v58  ;;  %2776 = vmatpush2.msra.mxu0 %v2703_v55  ;;  %v2702_v44 = vsel %vm804_vm15, %v2692_v58, %v2694_v59 }
 0xf6b   : > { %2777 = vmatprep.subr.mxu0 %v2702_v44 }
 0xf6c   : > { %2778 = vmatpush2.msra.mxu0 %v2701_v37 }
 0xf6d   : > { %2780 = vmatmul.mubr.f32.vlgmr.msra.gmra.mxu0 %v2421_v38 }
 0xf6e   : > { %2954 = vmatprep.mubr.msk.f32.mxu0 %vm467_vm4, %v2424_v52 }
 0xf71   : > { %2786 = vmatmul.mubr.f32.gmra.mxu0 %v2423_v8 }
0x102d   : > { %v2781_v19 = vpop.f32.mrf.mxu0 }
0x102e   : > { %v2782_v35 = vadd.f32 %v3121_v49, %v2781_v19 }
0x102f   : > { %v2783_v9 = vpop.f32.mrf.mxu0 }
0x1030   : > { %2792 = vst [vmem:[%s340_s2] sm:$0xff] %v2782_v35  ;;  %v2784_v26 = vadd.f32 %v3122_v36, %v2783_v9 }
0x1031   : > { %v2787_v29 = vpop.f32.mrf.mxu0 }
0x1032   : > { %2793 = vst [vmem:[%s340_s2 + $0x8] sm:$0xff] %v2784_v26  ;;  %v2788_v21 = vadd.f32 %v3123_v24, %v2787_v29 }
0x1033   : > { %v2789_v22 = vpop.f32.mrf.mxu0 }
0x1034   : > { %2794 = vst [vmem:[%s340_s2 + $0x10] sm:$0xff] %v2788_v21  ;;  %v2790_v0 = vadd.f32 %v3124_v45, %v2789_v22 }
0x1036   : > { %2795 = vst [vmem:[%s340_s2 + $0x18] sm:$0xff] %v2790_v0 }
0x1037   : > { %3244 = shalt.err (!%p3241_p10)
}
0x1038   : > { %s3245_s20 = scalar_lea.hbm %s4867_s13, 512  ;;  %s3249_s10 = scalar_lea.hbm %s4918_s7, 1024 }
0x1039   : > { %p3246_p6 = scmp.ne.s32.totalorder %s4867_s13, %s3245_s20  ;;  %p3250_p3 = scmp.lt.s32.totalorder %s4867_s13, %s4918_s7 }
0x103a   : > { %p3251_p11 = scmp.lt.s32.totalorder %s3249_s10, %s3245_s20 }
0x103b   : > { %p3247_p4 = pnand %p3246_p6, %p4999_p1 }
0x103c   : > { %p3252_p5 = por %p3251_p11, %p3250_p3 }
0x103d   : > { %p3248_p8 = pneg %p3247_p4 }
0x103f   : > { %p3253_p7 = pnand %p3252_p5, %p3248_p8 }
0x1041   : > { %3256 = shalt.err (!%p3253_p7)
}
0x1042   : > { %s3333_s9 = smov 256   ;;  %s5000_s30 = smov 16  }
0x1043   : > { %3012 = dma.vmem_to_hbm [thread:$0]  (%p4999_p1), %s4861_s11, 512, %s4867_s13, %s2797_s15, %s3333_s9, %s3333_s9, %s5000_s30  }
0x1044 PF: > { %s2825_s28 = sand.u32 1, %s3291_s24   ;;  %p5001_p12 = scmp.ne.s32.totalorder %s4955_s8, 0 }
0x1045   : > { %p5002_p9 = scmp.ge.s32.totalorder %s3303_s27, 2  ;;  %s2826_s21 = scalar_lea.sflag [#allocation4], %s2825_s28 }
0x1047   : > { %p3029_p13 = pnand %p5002_p9, %p5001_p12 }
0x1049   : > { %p3030_p0 = pneg %p3029_p13 }
0x104b   : > { %3286 = dma.done.wait (%p3030_p0), %s2826_s21, 512  }
0x104c   : > { %3288 = vsyncadd (%p3030_p0), %s2826_s21, 4294966784  ;;  %p22_p2 = scmp.ge.s32.totalorder %s3460_s17, 4   ;;  %s5003_s24 = smov %s3295_s25 }
0x104d   : > { %s5004_s25 = smov %s3299_s26  ;;  %s5005_s26 = smov %s3470_s22 }
0x104e   : > { %s5006_s27 = smov %s3460_s17  ;;  %24 = sbr.rel (!%p22_p2) target bundleno = 9 (0x9), region = 117 }
0x1053   :  { %2831 = vsyncpa [#allocation3], 1 }
0x1054   :  { %2833 = vsyncpa [#allocation3 + $0x1], 1 }
0x1055   :  { %2834 = vsyncpa [#allocation6], 1 }
0x1056   :  { %2835 = vsyncpa [#allocation9], 1 }
0x1057   :  { %2836 = vsyncpa [#allocation4], 1 }
0x1058   :  { %2838 = vsyncpa [#allocation4 + $0x1], 1 }

</bundles_post_ra>
